<compile_context>
chip_gen: v7x
topology: tpu7x:2x2x1
jax: 0.10.0
libtpu: 0.0.40
codegen_flags: <defaults>
</compile_context>

<pallas_src>
import math

import jax
import jax.numpy as jnp
from jax.experimental import pallas as pl
from jax.experimental.pallas import tpu as pltpu


# --------------------------------------------------------------------------- tiling

def _pick_row_tile(H, W, C, itemsize, budget_bytes=10 * 1024 * 1024):
    """Largest divisor R of H whose per-grid-step VMEM footprint fits the budget."""
    best = 1
    for R in range(1, H + 1):
        if H % R:
            continue
        est = itemsize * (
            2 * (R + 2) * (W + 2) * C      # double-buffered input row tile (halo'd)
            + 2 * 4 * R * W * C            # double-buffered output tile (R, 2, W, 2C)
            + 12 * R * W * C               # im2col taps + slab temporaries
        ) + 4 * R * W * 2 * C              # f32 matmul accumulator
        if est <= budget_bytes:
            best = R
    return best


def _halo_row_tiles(xp, R, n_tiles):
    """(B, H+2, Wp, C) zero-padded -> (B, n_tiles, R+2, Wp, C) overlapping row tiles.

    Duplicating the 2 halo rows costs ~(R+2)/R of the *input* (which is 1/4 the
    size of the output), and lets every grid step fetch its block with a plain,
    auto-pipelined BlockSpec (no whole-image residency, no manual DMA)."""
    row_idx = jnp.arange(n_tiles)[:, None] * R + jnp.arange(R + 2)[None, :]
    return xp[:, row_idx]


# ------------------------------------------------------------------ weight combining

def _combine_weights_2x(w_hwio):
    """Fold the nearest-2x duplication into the 3x3 weights.

    Returns (2, 6C, 2C): for each output-row phase a, a matrix mapping the 6 input
    taps (2 combined rows x 3 columns, C channels each) to the two width-phase
    outputs (2C channels, ordered [b=0 channels | b=1 channels])."""
    C = w_hwio.shape[2]
    w = w_hwio.astype(jnp.float32)
    # which of the 2 distinct (combined) input rows each conv tap dy hits, per row phase a
    Ra = jnp.array([[[1, 0, 0], [0, 1, 1]],
                    [[1, 1, 0], [0, 0, 1]]], jnp.float32)               # [a, i, dy]
    # which of the 3 slab columns j each conv tap dx hits, per width phase b
    Cb = jnp.array([[[1, 0, 0], [0, 1, 1], [0, 0, 0]],
                    [[0, 0, 0], [1, 1, 0], [0, 0, 1]]], jnp.float32)    # [b, j, dx]
    V = jnp.einsum('aiy,bjx,yxcd->aijcbd', Ra, Cb, w)                   # (2,2,3,C,2,C)
    return V.reshape(2, 6 * C, 2 * C)


# ----------------------------------------------------------------------- fused kernel

def _upconv_kernel(xt_ref, v_ref, b_ref, o_ref):
    """Fused nearest-2x upsample + 3x3 same conv, one halo'd row tile per grid step.

    xt_ref: (1, 1, R+2, W+2, C)  zero-padded input row tile (halo of 2 rows)
    v_ref : (2, 6C, 2C)          phase-combined weights [row_phase, (i,j,cin), (b,cout)]
    b_ref : (1, 2C)              bias duplicated for both width phases (f32)
    o_ref : (1, R, 2, W, 2C)     output tile; reshapes (free) to rows [2R, 2W, C]
    """
    R = o_ref.shape[1]
    W = o_ref.shape[3]
    C = xt_ref.shape[-1]

    for a in range(2):                               # output-row phase (even/odd rows)
        # im2col slab: 6 taps = 2 combined rows (i) x 3 column shifts (j)
        taps = [xt_ref[0, 0, pl.ds(a + i, R), pl.ds(j, W), :]
                for i in range(2) for j in range(3)]
        slab = jnp.concatenate(taps, axis=-1).reshape(R * W, 6 * C)
        acc = jnp.dot(slab, v_ref[a], preferred_element_type=jnp.float32)
        acc = acc + b_ref[...]
        # acc row m = s*W + t holds [out[2s+a, 2t, :], out[2s+a, 2t+1, :]] in its 2C
        # lanes -> identical memory order to the interleaved output row: plain store.
        o_ref[0, :, a, :, :] = acc.reshape(R, W, 2 * C).astype(o_ref.dtype)


def upsample2x_conv3x3_nhwc(x, w_hwio, bias, *, compute_dtype=None,
                            vmem_limit_bytes=48 * 1024 * 1024):
    """Fused nearest-2x upsample + 3x3 / stride-1 / pad-1 conv.  NHWC in/out."""
    B, H, W, C = x.shape
    cdt = jnp.dtype(compute_dtype) if compute_dtype is not None else x.dtype
    pw = (-W) % 8                       # keep in-kernel sublane reshapes tile-aligned
    Wk = W + pw
    R = _pick_row_tile(H, Wk, C, jnp.dtype(cdt).itemsize)
    n_tiles = H // R

    # Pad by 1 (conv "same") and out to width Wk; extra zero columns only produce
    # output columns that get cropped, so results are unchanged.
    xp = jnp.pad(x.astype(cdt), ((0, 0), (1, 1), (1, 1 + pw), (0, 0)))
    xt = _halo_row_tiles(xp, R, n_tiles)                  # (B, nt, R+2, Wk+2, C)
    v = _combine_weights_2x(w_hwio).astype(cdt)           # (2, 6C, 2C)
    b2 = jnp.concatenate([bias, bias]).astype(jnp.float32).reshape(1, 2 * C)
    # TODO(synk): for very large C (f32 weights > ~20 MiB) add an output-channel grid
    # axis so the (2, 6C, 2C) weight block is tiled instead of fully resident.

    out5 = pl.pallas_call(
        _upconv_kernel,
        out_shape=jax.ShapeDtypeStruct((B, H, 2, Wk, 2 * C), x.dtype),
        grid_spec=pltpu.PrefetchScalarGridSpec(
            num_scalar_prefetch=0,
            grid=(B, n_tiles),
            in_specs=[
                pl.BlockSpec((1, 1, R + 2, Wk + 2, C),
                             lambda bi, ti: (bi, ti, 0, 0, 0)),
                pl.BlockSpec((2, 6 * C, 2 * C), lambda bi, ti: (0, 0, 0)),
                pl.BlockSpec((1, 2 * C), lambda bi, ti: (0, 0)),
            ],
            out_specs=pl.BlockSpec((1, R, 2, Wk, 2 * C),
                                   lambda bi, ti: (bi, ti, 0, 0, 0)),
        ),
        compiler_params=pltpu.CompilerParams(
            dimension_semantics=("parallel", "parallel"),
            vmem_limit_bytes=vmem_limit_bytes),
    )(xt, v, b2)

    out = out5.reshape(B, 2 * H, 2 * Wk, C)   # free reshape: identical memory order
    if pw:
        out = out[:, :, : 2 * W, :]
    return out


# ---------------------------------------------------- generic conv3x3 (output_size path)

def _conv3x3_kernel(xt_ref, w_ref, b_ref, o_ref):
    """Plain 3x3 same conv on a halo'd row tile (used when output_size != exact 2x).

    xt_ref: (1, 1, R+2, W+2, C);  w_ref: (9C, C);  b_ref: (1, C);  o_ref: (1, R, W, C)
    """
    R = o_ref.shape[1]
    W = o_ref.shape[2]
    C = xt_ref.shape[-1]
    taps = [xt_ref[0, 0, pl.ds(dy, R), pl.ds(dx, W), :]
            for dy in range(3) for dx in range(3)]
    slab = jnp.concatenate(taps, axis=-1).reshape(R * W, 9 * C)
    acc = jnp.dot(slab, w_ref[...], preferred_element_type=jnp.float32) + b_ref[...]
    o_ref[0] = acc.reshape(R, W, C).astype(o_ref.dtype)


def conv3x3_same_nhwc(x, w_hwio, bias, *, compute_dtype=None,
                      vmem_limit_bytes=48 * 1024 * 1024):
    B, H, W, C = x.shape
    cdt = jnp.dtype(compute_dtype) if compute_dtype is not None else x.dtype
    pw = (-W) % 8
    Wk = W + pw
    R = _pick_row_tile(H, Wk, C, jnp.dtype(cdt).itemsize)
    n_tiles = H // R

    xp = jnp.pad(x.astype(cdt), ((0, 0), (1, 1), (1, 1 + pw), (0, 0)))
    xt = _halo_row_tiles(xp, R, n_tiles)
    w9 = w_hwio.reshape(9 * C, C).astype(cdt)
    b2 = bias.astype(jnp.float32).reshape(1, C)

    out = pl.pallas_call(
        _conv3x3_kernel,
        out_shape=jax.ShapeDtypeStruct((B, H, Wk, C), x.dtype),
        grid_spec=pltpu.PrefetchScalarGridSpec(
            num_scalar_prefetch=0,
            grid=(B, n_tiles),
            in_specs=[
                pl.BlockSpec((1, 1, R + 2, Wk + 2, C),
                             lambda bi, ti: (bi, ti, 0, 0, 0)),
                pl.BlockSpec((9 * C, C), lambda bi, ti: (0, 0)),
                pl.BlockSpec((1, C), lambda bi, ti: (0, 0)),
            ],
            out_specs=pl.BlockSpec((1, R, Wk, C), lambda bi, ti: (bi, ti, 0, 0)),
        ),
        compiler_params=pltpu.CompilerParams(
            dimension_semantics=("parallel", "parallel"),
            vmem_limit_bytes=vmem_limit_bytes),
    )(xt, w9, b2)
    if pw:
        out = out[:, :, :W, :]
    return out


# ------------------------------------------------------------------------- module glue

def _nearest_resize_nhwc(x, out_hw):
    """Nearest-neighbor resize (pure replication glue; matches F.interpolate 'nearest')."""
    oh, ow = out_hw
    ih, iw = x.shape[1], x.shape[2]
    ri = (jnp.arange(oh) * ih) // oh
    ci = (jnp.arange(ow) * iw) // ow
    return x[:, ri][:, :, ci]


class UpsamplePallas:
    """Pallas port of the diffusion/unet Upsample module (forward only)."""

    def __init__(self, in_channels, with_conv, key, compute_dtype=None):
        self.with_conv = with_conv
        self.compute_dtype = compute_dtype      # e.g. jnp.bfloat16 on v6e/v7x
        if with_conv:
            # torch.nn.Conv2d default init: U(-1/sqrt(fan_in), 1/sqrt(fan_in))
            fan_in = in_channels * 3 * 3
            bound = 1.0 / math.sqrt(fan_in)
            k1, k2 = jax.random.split(key)
            # stored HWIO (= PyTorch (Cout, Cin, 3, 3) transposed to (3, 3, Cin, Cout))
            self.w = jax.random.uniform(
                k1, (3, 3, in_channels, in_channels), jnp.float32, -bound, bound)
            self.b = jax.random.uniform(
                k2, (in_channels,), jnp.float32, -bound, bound)

    def __call__(self, x_nchw, output_size=None):
        B, C, H, W = x_nchw.shape
        x = jnp.transpose(x_nchw, (0, 2, 3, 1))                 # NCHW -> NHWC
        is_exact_2x = output_size is None or tuple(output_size) == (2 * H, 2 * W)
        if self.with_conv and is_exact_2x:
            y = upsample2x_conv3x3_nhwc(x, self.w, self.b,
                                        compute_dtype=self.compute_dtype)
        else:
            out_hw = (2 * H, 2 * W) if output_size is None else tuple(output_size)
            y = _nearest_resize_nhwc(x, out_hw)     # pure replication (layout glue)
            if self.with_conv:
                y = conv3x3_same_nhwc(y, self.w, self.b,
                                      compute_dtype=self.compute_dtype)
        return jnp.transpose(y, (0, 3, 1, 2))                   # NHWC -> NCHW


# ------------------------------------------------------------------------------- test

if __name__ == "__main__":
    key = jax.random.PRNGKey(0)
    k_param, k_x = jax.random.split(key)

    B, C, H, W = 2, 4, 16, 16
    x = jax.random.normal(k_x, (B, C, H, W), jnp.float32)

    module = UpsamplePallas(in_channels=C, with_conv=True, key=k_param)
    out = jax.block_until_ready(module(x))                      # fused 2x path
    assert out.shape == (B, C, 2 * H, 2 * W), out.shape

    # f32 reference: XLA conv on the nearest-2x upsampled input.
    x_nhwc = jnp.transpose(x, (0, 2, 3, 1))
    x_up = jnp.repeat(jnp.repeat(x_nhwc, 2, axis=1), 2, axis=2)
    ref = jax.lax.conv_general_dilated(
        x_up, module.w, window_strides=(1, 1), padding="SAME",
        dimension_numbers=("NHWC", "HWIO", "NHWC")) + module.b
    ref = jnp.transpose(ref, (0, 3, 1, 2))
    assert jnp.allclose(out, ref, rtol=1e-4, atol=1e-4), \
        float(jnp.max(jnp.abs(out - ref)))

    # output_size equal to exact 2x routes to the same fused kernel.
    out2 = jax.block_until_ready(module(x, output_size=(2 * H, 2 * W)))
    assert jnp.allclose(out2, ref, rtol=1e-4, atol=1e-4)

    # Non-2x output_size: wrapper nearest resize + generic conv3x3 kernel.
    oh, ow = 2 * H - 1, 2 * W + 1
    out3 = jax.block_until_ready(module(x, output_size=(oh, ow)))
    assert out3.shape == (B, C, oh, ow), out3.shape
    x_rs = _nearest_resize_nhwc(x_nhwc, (oh, ow))
    ref3 = jax.lax.conv_general_dilated(
        x_rs, module.w, window_strides=(1, 1), padding="SAME",
        dimension_numbers=("NHWC", "HWIO", "NHWC")) + module.b
    assert jnp.allclose(out3, jnp.transpose(ref3, (0, 3, 1, 2)),
                        rtol=1e-4, atol=1e-4), \
        float(jnp.max(jnp.abs(out3 - jnp.transpose(ref3, (0, 3, 1, 2)))))

    # bf16-compute path (MXU-native operands on v6e/v7x; f32 accumulation) — loose check.
    module_bf16 = UpsamplePallas(in_channels=C, with_conv=True, key=k_param,
                                 compute_dtype=jnp.bfloat16)
    out_bf16 = jax.block_until_ready(module_bf16(x))
    assert float(jnp.max(jnp.abs(out_bf16 - ref))) < 1e-1

    # with_conv=False path: pure nearest upsample.
    module_nc = UpsamplePallas(in_channels=C, with_conv=False, key=k_param)
    out_nc = jax.block_until_ready(module_nc(x))
    assert jnp.allclose(out_nc, jnp.transpose(x_up, (0, 3, 1, 2)))

    print("KERNEL_OK")
</pallas_src>

<mosaic_0001>
module attributes {stable_mosaic.version = 11 : i64} {
  func.func @_upconv_kernel(%arg0: i32, %arg1: i32, %arg2: memref<1x1x18x18x4xf32, #tpu.memory_space<vmem>>, %arg3: memref<2x24x8xf32, #tpu.memory_space<vmem>>, %arg4: memref<1x8xf32, #tpu.memory_space<vmem>>, %arg5: memref<1x16x2x16x8xf32, #tpu.memory_space<vmem>>) attributes {dimension_semantics = [#tpu.dimension_semantics<parallel>, #tpu.dimension_semantics<parallel>], iteration_bounds = array<i64: 2, 1>, scalar_prefetch = 0 : i64, scratch_operands = 0 : i64, tpu.core_type = #tpu.core_type<tc>, window_params = [{transform_indices = @transform_0, window_bounds = array<i64: 1, 1, 18, 18, 4>}, {pipeline_mode = #tpu.pipeline_mode<synchronous>, transform_indices = @transform_1, window_bounds = array<i64: 2, 24, 8>}, {pipeline_mode = #tpu.pipeline_mode<synchronous>, transform_indices = @transform_2, window_bounds = array<i64: 1, 8>}, {transform_indices = @transform_3, window_bounds = array<i64: 1, 16, 2, 16, 8>}]} {
    %c0 = arith.constant 0 : index
    %c0_0 = arith.constant 0 : index
    %c0_1 = arith.constant 0 : index
    %c0_2 = arith.constant 0 : index
    %c0_3 = arith.constant 0 : index
    %0 = vector.load %arg2[%c0, %c0_0, %c0_1, %c0_2, %c0_3] : memref<1x1x18x18x4xf32, #tpu.memory_space<vmem>>, vector<1x1x16x16x4xf32>
    %1 = vector.shape_cast %0 : vector<1x1x16x16x4xf32> to vector<16x16x4xf32>
    %c0_4 = arith.constant 0 : index
    %c0_5 = arith.constant 0 : index
    %c0_6 = arith.constant 0 : index
    %c1 = arith.constant 1 : index
    %c0_7 = arith.constant 0 : index
    %2 = vector.load %arg2[%c0_4, %c0_5, %c0_6, %c1, %c0_7] : memref<1x1x18x18x4xf32, #tpu.memory_space<vmem>>, vector<1x1x16x16x4xf32>
    %3 = vector.shape_cast %2 : vector<1x1x16x16x4xf32> to vector<16x16x4xf32>
    %c0_8 = arith.constant 0 : index
    %c0_9 = arith.constant 0 : index
    %c0_10 = arith.constant 0 : index
    %c2 = arith.constant 2 : index
    %c0_11 = arith.constant 0 : index
    %4 = vector.load %arg2[%c0_8, %c0_9, %c0_10, %c2, %c0_11] : memref<1x1x18x18x4xf32, #tpu.memory_space<vmem>>, vector<1x1x16x16x4xf32>
    %5 = vector.shape_cast %4 : vector<1x1x16x16x4xf32> to vector<16x16x4xf32>
    %c0_12 = arith.constant 0 : index
    %c0_13 = arith.constant 0 : index
    %c1_14 = arith.constant 1 : index
    %c0_15 = arith.constant 0 : index
    %c0_16 = arith.constant 0 : index
    %6 = vector.load %arg2[%c0_12, %c0_13, %c1_14, %c0_15, %c0_16] : memref<1x1x18x18x4xf32, #tpu.memory_space<vmem>>, vector<1x1x16x16x4xf32>
    %7 = vector.shape_cast %6 : vector<1x1x16x16x4xf32> to vector<16x16x4xf32>
    %c0_17 = arith.constant 0 : index
    %c0_18 = arith.constant 0 : index
    %c1_19 = arith.constant 1 : index
    %c1_20 = arith.constant 1 : index
    %c0_21 = arith.constant 0 : index
    %8 = vector.load %arg2[%c0_17, %c0_18, %c1_19, %c1_20, %c0_21] : memref<1x1x18x18x4xf32, #tpu.memory_space<vmem>>, vector<1x1x16x16x4xf32>
    %9 = vector.shape_cast %8 : vector<1x1x16x16x4xf32> to vector<16x16x4xf32>
    %c0_22 = arith.constant 0 : index
    %c0_23 = arith.constant 0 : index
    %c1_24 = arith.constant 1 : index
    %c2_25 = arith.constant 2 : index
    %c0_26 = arith.constant 0 : index
    %10 = vector.load %arg2[%c0_22, %c0_23, %c1_24, %c2_25, %c0_26] : memref<1x1x18x18x4xf32, #tpu.memory_space<vmem>>, vector<1x1x16x16x4xf32>
    %11 = vector.shape_cast %10 : vector<1x1x16x16x4xf32> to vector<16x16x4xf32>
    %12 = tpu.concatenate %1, %3, %5, %7, %9, %11 in 2 : vector<16x16x4xf32>, vector<16x16x4xf32>, vector<16x16x4xf32>, vector<16x16x4xf32>, vector<16x16x4xf32>, vector<16x16x4xf32> -> vector<16x16x24xf32>
    %13 = vector.shape_cast %12 : vector<16x16x24xf32> to vector<256x24xf32>
    %c0_27 = arith.constant 0 : index
    %c0_28 = arith.constant 0 : index
    %c0_29 = arith.constant 0 : index
    %14 = vector.load %arg3[%c0_27, %c0_28, %c0_29] : memref<2x24x8xf32, #tpu.memory_space<vmem>>, vector<1x24x8xf32>
    %15 = vector.shape_cast %14 : vector<1x24x8xf32> to vector<24x8xf32>
    %cst = arith.constant dense<0.000000e+00> : vector<256x8xf32>
    %16 = tpu.matmul %13, %15, %cst {dimension_numbers = #tpu.dot_dimension_numbers<[1], [0], [0], [1], [0, 0, 1, 1], [], []>} : vector<256x24xf32>, vector<24x8xf32>, vector<256x8xf32> -> vector<256x8xf32>
    %c0_30 = arith.constant 0 : index
    %c0_31 = arith.constant 0 : index
    %17 = vector.load %arg4[%c0_30, %c0_31] : memref<1x8xf32, #tpu.memory_space<vmem>>, vector<1x8xf32>
    %18 = vector.broadcast %17 : vector<1x8xf32> to vector<256x8xf32>
    %19 = arith.addf %16, %18 : vector<256x8xf32>
    %20 = vector.shape_cast %19 : vector<256x8xf32> to vector<16x16x8xf32>
    %c0_32 = arith.constant 0 : index
    %c0_33 = arith.constant 0 : index
    %c0_34 = arith.constant 0 : index
    %c0_35 = arith.constant 0 : index
    %c0_36 = arith.constant 0 : index
    %21 = vector.load %arg5[%c0_32, %c0_33, %c0_34, %c0_35, %c0_36] : memref<1x16x2x16x8xf32, #tpu.memory_space<vmem>>, vector<1x16x1x16x8xf32>
    %22 = vector.shape_cast %21 : vector<1x16x1x16x8xf32> to vector<16x16x8xf32>
    %23 = vector.shape_cast %20 : vector<16x16x8xf32> to vector<1x16x1x16x8xf32>
    tpu.vector_store %arg5[%c0_32, %c0_33, %c0_34, %c0_35, %c0_36], %23 {strides = array<i32>} : memref<1x16x2x16x8xf32, #tpu.memory_space<vmem>>, vector<1x16x1x16x8xf32>,
    %c0_37 = arith.constant 0 : index
    %c0_38 = arith.constant 0 : index
    %c1_39 = arith.constant 1 : index
    %c0_40 = arith.constant 0 : index
    %c0_41 = arith.constant 0 : index
    %24 = vector.load %arg2[%c0_37, %c0_38, %c1_39, %c0_40, %c0_41] : memref<1x1x18x18x4xf32, #tpu.memory_space<vmem>>, vector<1x1x16x16x4xf32>
    %25 = vector.shape_cast %24 : vector<1x1x16x16x4xf32> to vector<16x16x4xf32>
    %c0_42 = arith.constant 0 : index
    %c0_43 = arith.constant 0 : index
    %c1_44 = arith.constant 1 : index
    %c1_45 = arith.constant 1 : index
    %c0_46 = arith.constant 0 : index
    %26 = vector.load %arg2[%c0_42, %c0_43, %c1_44, %c1_45, %c0_46] : memref<1x1x18x18x4xf32, #tpu.memory_space<vmem>>, vector<1x1x16x16x4xf32>
    %27 = vector.shape_cast %26 : vector<1x1x16x16x4xf32> to vector<16x16x4xf32>
    %c0_47 = arith.constant 0 : index
    %c0_48 = arith.constant 0 : index
    %c1_49 = arith.constant 1 : index
    %c2_50 = arith.constant 2 : index
    %c0_51 = arith.constant 0 : index
    %28 = vector.load %arg2[%c0_47, %c0_48, %c1_49, %c2_50, %c0_51] : memref<1x1x18x18x4xf32, #tpu.memory_space<vmem>>, vector<1x1x16x16x4xf32>
    %29 = vector.shape_cast %28 : vector<1x1x16x16x4xf32> to vector<16x16x4xf32>
    %c0_52 = arith.constant 0 : index
    %c0_53 = arith.constant 0 : index
    %c2_54 = arith.constant 2 : index
    %c0_55 = arith.constant 0 : index
    %c0_56 = arith.constant 0 : index
    %30 = vector.load %arg2[%c0_52, %c0_53, %c2_54, %c0_55, %c0_56] : memref<1x1x18x18x4xf32, #tpu.memory_space<vmem>>, vector<1x1x16x16x4xf32>
    %31 = vector.shape_cast %30 : vector<1x1x16x16x4xf32> to vector<16x16x4xf32>
    %c0_57 = arith.constant 0 : index
    %c0_58 = arith.constant 0 : index
    %c2_59 = arith.constant 2 : index
    %c1_60 = arith.constant 1 : index
    %c0_61 = arith.constant 0 : index
    %32 = vector.load %arg2[%c0_57, %c0_58, %c2_59, %c1_60, %c0_61] : memref<1x1x18x18x4xf32, #tpu.memory_space<vmem>>, vector<1x1x16x16x4xf32>
    %33 = vector.shape_cast %32 : vector<1x1x16x16x4xf32> to vector<16x16x4xf32>
    %c0_62 = arith.constant 0 : index
    %c0_63 = arith.constant 0 : index
    %c2_64 = arith.constant 2 : index
    %c2_65 = arith.constant 2 : index
    %c0_66 = arith.constant 0 : index
    %34 = vector.load %arg2[%c0_62, %c0_63, %c2_64, %c2_65, %c0_66] : memref<1x1x18x18x4xf32, #tpu.memory_space<vmem>>, vector<1x1x16x16x4xf32>
    %35 = vector.shape_cast %34 : vector<1x1x16x16x4xf32> to vector<16x16x4xf32>
    %36 = tpu.concatenate %25, %27, %29, %31, %33, %35 in 2 : vector<16x16x4xf32>, vector<16x16x4xf32>, vector<16x16x4xf32>, vector<16x16x4xf32>, vector<16x16x4xf32>, vector<16x16x4xf32> -> vector<16x16x24xf32>
    %37 = vector.shape_cast %36 : vector<16x16x24xf32> to vector<256x24xf32>
    %c1_67 = arith.constant 1 : index
    %c0_68 = arith.constant 0 : index
    %c0_69 = arith.constant 0 : index
    %38 = vector.load %arg3[%c1_67, %c0_68, %c0_69] : memref<2x24x8xf32, #tpu.memory_space<vmem>>, vector<1x24x8xf32>
    %39 = vector.shape_cast %38 : vector<1x24x8xf32> to vector<24x8xf32>
    %cst_70 = arith.constant dense<0.000000e+00> : vector<256x8xf32>
    %40 = tpu.matmul %37, %39, %cst_70 {dimension_numbers = #tpu.dot_dimension_numbers<[1], [0], [0], [1], [0, 0, 1, 1], [], []>} : vector<256x24xf32>, vector<24x8xf32>, vector<256x8xf32> -> vector<256x8xf32>
    %c0_71 = arith.constant 0 : index
    %c0_72 = arith.constant 0 : index
    %41 = vector.load %arg4[%c0_71, %c0_72] : memref<1x8xf32, #tpu.memory_space<vmem>>, vector<1x8xf32>
    %42 = vector.broadcast %41 : vector<1x8xf32> to vector<256x8xf32>
    %43 = arith.addf %40, %42 : vector<256x8xf32>
    %44 = vector.shape_cast %43 : vector<256x8xf32> to vector<16x16x8xf32>
    %c0_73 = arith.constant 0 : index
    %c0_74 = arith.constant 0 : index
    %c1_75 = arith.constant 1 : index
    %c0_76 = arith.constant 0 : index
    %c0_77 = arith.constant 0 : index
    %45 = vector.load %arg5[%c0_73, %c0_74, %c1_75, %c0_76, %c0_77] : memref<1x16x2x16x8xf32, #tpu.memory_space<vmem>>, vector<1x16x1x16x8xf32>
    %46 = vector.shape_cast %45 : vector<1x16x1x16x8xf32> to vector<16x16x8xf32>
    %47 = vector.shape_cast %44 : vector<16x16x8xf32> to vector<1x16x1x16x8xf32>
    tpu.vector_store %arg5[%c0_73, %c0_74, %c1_75, %c0_76, %c0_77], %47 {strides = array<i32>} : memref<1x16x2x16x8xf32, #tpu.memory_space<vmem>>, vector<1x16x1x16x8xf32>,
    return
  }
  func.func @transform_0(%arg0: i32, %arg1: i32) -> (i32, i32, i32, i32, i32) {
    %c0_i32 = arith.constant 0 : i32
    %c0_i32_0 = arith.constant 0 : i32
    %c0_i32_1 = arith.constant 0 : i32
    %c0_i32_2 = arith.constant 0 : i32
    return %arg0, %arg1, %c0_i32, %c0_i32_0, %c0_i32_1 : i32, i32, i32, i32, i32
  }
  func.func @transform_1(%arg0: i32, %arg1: i32) -> (i32, i32, i32) {
    %c0_i32 = arith.constant 0 : i32
    %c0_i32_0 = arith.constant 0 : i32
    %c0_i32_1 = arith.constant 0 : i32
    %c0_i32_2 = arith.constant 0 : i32
    return %c0_i32, %c0_i32_0, %c0_i32_1 : i32, i32, i32
  }
  func.func @transform_2(%arg0: i32, %arg1: i32) -> (i32, i32) {
    %c0_i32 = arith.constant 0 : i32
    %c0_i32_0 = arith.constant 0 : i32
    %c0_i32_1 = arith.constant 0 : i32
    return %c0_i32, %c0_i32_0 : i32, i32
  }
  func.func @transform_3(%arg0: i32, %arg1: i32) -> (i32, i32, i32, i32, i32) {
    %c0_i32 = arith.constant 0 : i32
    %c0_i32_0 = arith.constant 0 : i32
    %c0_i32_1 = arith.constant 0 : i32
    %c0_i32_2 = arith.constant 0 : i32
    return %arg0, %arg1, %c0_i32, %c0_i32_0, %c0_i32_1 : i32, i32, i32, i32, i32
  }
}

</mosaic_0001>

<bundles_post_ra>
// kernel: tpu_custom_call.1
= control target key start
LH: loop header
LB: loop body
LE: loop exit
PB: predicated region body
PF: predicated region fallthrough
CT: control target
= control target key end

     0   :  { %s3700_s12 = smov 0   ;;  %s3702_s13 = smov 0   ;;  %s5673_s0 = inlined_call_operand.vmem [shape: f32[2,1,18,18,4], index: 0, kind: input, shape index: {}]   ;;  %s5674_s1 = inlined_call_operand.vmem [shape: f32[2,24,8], index: 1, kind: input, shape index: {}]   ;;  %s5675_s2 = inlined_call_operand.vmem [shape: f32[1,8], index: 2, kind: input, shape index: {}]   ;;  %s5676_s3 = inlined_call_operand.vmem [shape: f32[2,16,2,16,8], index: 3, kind: output, shape index: {}]  }
   0x1   :  { %s3704_s14 = smov 0  }
   0x2 LB: > { %s25_s15 = sadd.s32 1, %s3669_s13  ;;  %p3030_p0 = scmp.ge.s32.totalorder %s3673_s14, 1  ;;  %s3673_s14 = sphi %s3704_s14, %s13_s14   ;;  %s3669_s13 = sphi %s3702_s13, %s5913_s13   ;;  %s3665_s12 = sphi %s3700_s12, %s5912_s12  }
   0x3   : > { %p27_p1 = scmp.ge.s32.totalorder %s25_s15, 2  ;;  %p157_p2 = scmp.lt.s32.totalorder %s3673_s14, 3 }
   0x5   : > { %s5915_s15 = smov (%p27_p1, %s25_s15), 0  ;;  %p158_p3 = pnand %p3030_p0, %p157_p2 }
   0x7   : > { %161 = sbr.rel (%p158_p3) target bundleno = 990 (0x3de), region = 32 }
   0xe   : > { %p190_p4 = scmp.lt.s32.totalorder %s3665_s12, 1  ;;  %s3675_s20 = smov 4   ;;  %vm1043_vm0 = vcmask 31744   ;;  %vm1076_vm1 = vcmask 64512   ;;  %vm1109_vm2 = vcmask 97280   ;;  %vm1142_vm3 = vcmask 130048  }
   0xf   : > { %s3676_s21 = smov 8   ;;  %s3677_s22 = smov 12   ;;  %vm1175_vm4 = vcmask 162816   ;;  %vm1218_vm5 = vcmask 195584  }
  0x10   : > { %s5917_s12 = smov (!%p190_p4, %s3665_s12), 1  ;;  %s3678_s23 = smov 16  }
  0x11   : > { %s3612_s16 = smul.u32 432, %s5917_s12  ;;  %s3679_s30 = smov 20  }
  0x12   : > { %s3425_s10 = sshll.u32 %s5917_s12, 9 }
  0x13   : > { %s3724_s19 = scalar_lea.vmem %s5673_s0, %s3612_s16  ;;  %s5189_s24 = scalar_lea.vmem %s5676_s3, %s3425_s10 }
  0x14   : > { %v3727_v0 = vld [vmem:[%s3724_s19 + $0x19] sm:$0xff]  ;;  %v242_v1 = vld [vmem:[%s3724_s19 + $0x1] sm:$0xff]  ;;  %v243_v3 = vld [vmem:[%s3724_s19 + $0x9] sm:$0xff] }
  0x15   : > { %439 = vrot.lane.b32.xlu1 %v3727_v0, %s3675_s20  ;;  %435 = vrot.lane.b32.xlu0 %v242_v1, %s3675_s20  ;;  %v3734_v2 = vld [vmem:[%s3724_s19 + $0x21] sm:$0xff]  ;;  %v3741_v4 = vld [vmem:[%s3724_s19 + $0x39] sm:$0xff] }
  0x16   : > { %v3744_v5 = vld [vmem:[%s3724_s19 + $0x31] sm:$0xff]  ;;  %v3754_v7 = vld [vmem:[%s3724_s19 + $0x49] sm:$0xff]  ;;  %v3764_v9 = vld [vmem:[%s3724_s19 + $0x61] sm:$0xff] }
  0x17   : > { %v3751_v6 = vld [vmem:[%s3724_s19 + $0x51] sm:$0xff]  ;;  %v3761_v8 = vld [vmem:[%s3724_s19 + $0x69] sm:$0xff]  ;;  %v3771_v10 = vld [vmem:[%s3724_s19 + $0x81] sm:$0xff] }
  0x18   : > { %v3774_v11 = vld [vmem:[%s3724_s19 + $0x79] sm:$0xff]  ;;  %v3784_v13 = vld [vmem:[%s3724_s19 + $0x91] sm:$0xff]  ;;  %v3794_v15 = vld [vmem:[%s3724_s19 + $0xa9] sm:$0xff] }
  0x19   : > { %441 = vrot.lane.b32.xlu1 %v3734_v2, %s3675_s20  ;;  %437 = vrot.lane.b32.xlu0 %v243_v3, %s3675_s20  ;;  %v3781_v12 = vld [vmem:[%s3724_s19 + $0x99] sm:$0xff]  ;;  %v3791_v14 = vld [vmem:[%s3724_s19 + $0xb1] sm:$0xff] }
  0x1a   : > { %v3801_v16 = vld [vmem:[%s3724_s19 + $0xc9] sm:$0xff]  ;;  %v3804_v17 = vld [vmem:[%s3724_s19 + $0xc1] sm:$0xff]  ;;  %v3814_v19 = vld [vmem:[%s3724_s19 + $0xd9] sm:$0xff] }
  0x1b   : > { %v3811_v18 = vld [vmem:[%s3724_s19 + $0xe1] sm:$0xff]  ;;  %v3821_v20 = vld [vmem:[%s3724_s19 + $0xf9] sm:$0xff]  ;;  %v3824_v21 = vld [vmem:[%s3724_s19 + $0xf1] sm:$0xff] }
  0x1c   : > { %v3831_v22 = vld [vmem:[%s3724_s19 + $0x111] sm:$0xff]  ;;  %v3834_v23 = vld [vmem:[%s3724_s19 + $0x109] sm:$0xff]  ;;  %v3844_v25 = vld [vmem:[%s3724_s19 + $0x121] sm:$0xff] }
  0x1d   : > { %445 = vrot.lane.b32.xlu1 %v3741_v4, %s3675_s20  ;;  %443 = vrot.lane.b32.xlu0 %v3744_v5, %s3675_s20  ;;  %v3841_v24 = vld [vmem:[%s3724_s19 + $0x129] sm:$0xff]  ;;  %v3851_v26 = vld [vmem:[%s3724_s19 + $0x141] sm:$0xff] }
  0x1e   : > { %v3854_v27 = vld [vmem:[%s3724_s19 + $0x139] sm:$0xff]  ;;  %v3864_v29 = vld [vmem:[%s3724_s19 + $0x151] sm:$0xff]  ;;  %v3874_v31 = vld [vmem:[%s3724_s19 + $0x169] sm:$0xff] }
  0x1f   : > { %v3861_v28 = vld [vmem:[%s3724_s19 + $0x159] sm:$0xff]  ;;  %v3871_v30 = vld [vmem:[%s3724_s19 + $0x171] sm:$0xff]  ;;  %v274_v33 = vld [vmem:[%s3724_s19 + $0x2] sm:$0xff] }
  0x20   : > { %v275_v32 = vld [vmem:[%s3724_s19 + $0xa] sm:$0xff]  ;;  %v3885_v34 = vld [vmem:[%s3724_s19 + $0x22] sm:$0xff]  ;;  %v3888_v35 = vld [vmem:[%s3724_s19 + $0x1a] sm:$0xff] }
  0x21   : > { %449 = vrot.lane.b32.xlu1 %v3751_v6, %s3675_s20  ;;  %447 = vrot.lane.b32.xlu0 %v3754_v7, %s3675_s20  ;;  %v3895_v36 = vld [vmem:[%s3724_s19 + $0x3a] sm:$0xff]  ;;  %v3898_v37 = vld [vmem:[%s3724_s19 + $0x32] sm:$0xff] }
  0x22   : > { %v3905_v38 = vld [vmem:[%s3724_s19 + $0x52] sm:$0xff]  ;;  %v3908_v39 = vld [vmem:[%s3724_s19 + $0x4a] sm:$0xff]  ;;  %v3918_v41 = vld [vmem:[%s3724_s19 + $0x62] sm:$0xff] }
  0x23   : > { %v3915_v40 = vld [vmem:[%s3724_s19 + $0x6a] sm:$0xff]  ;;  %v3925_v42 = vld [vmem:[%s3724_s19 + $0x82] sm:$0xff]  ;;  %v3928_v43 = vld [vmem:[%s3724_s19 + $0x7a] sm:$0xff] }
  0x24   : > { %v3935_v44 = vld [vmem:[%s3724_s19 + $0x9a] sm:$0xff]  ;;  %v3938_v45 = vld [vmem:[%s3724_s19 + $0x92] sm:$0xff]  ;;  %v3948_v47 = vld [vmem:[%s3724_s19 + $0xaa] sm:$0xff] }
  0x25   : > { %453 = vrot.lane.b32.xlu1 %v3761_v8, %s3675_s20  ;;  %451 = vrot.lane.b32.xlu0 %v3764_v9, %s3675_s20  ;;  %v3945_v46 = vld [vmem:[%s3724_s19 + $0xb2] sm:$0xff]  ;;  %v3955_v48 = vld [vmem:[%s3724_s19 + $0xca] sm:$0xff] }
  0x26   : > { %v3958_v49 = vld [vmem:[%s3724_s19 + $0xc2] sm:$0xff]  ;;  %v3968_v51 = vld [vmem:[%s3724_s19 + $0xda] sm:$0xff]  ;;  %v3978_v53 = vld [vmem:[%s3724_s19 + $0xf2] sm:$0xff] }
  0x27   : > { %v3965_v50 = vld [vmem:[%s3724_s19 + $0xe2] sm:$0xff]  ;;  %v3975_v52 = vld [vmem:[%s3724_s19 + $0xfa] sm:$0xff]  ;;  %v3985_v54 = vld [vmem:[%s3724_s19 + $0x112] sm:$0xff] }
  0x28   : > { %v3988_v55 = vld [vmem:[%s3724_s19 + $0x10a] sm:$0xff]  ;;  %v3996_v57 = vld [vmem:[%s3724_s19 + $0x122] sm:$0xff]  ;;  %v300_v59 = vld [vmem:[%s3724_s19 + $0x13a] sm:$0xff] }
  0x29   : > { %457 = vrot.lane.b32.xlu1 %v3771_v10, %s3675_s20  ;;  %455 = vrot.lane.b32.xlu0 %v3774_v11, %s3675_s20  ;;  %v299_v56 = vld [vmem:[%s3724_s19 + $0x12a] sm:$0xff]  ;;  %v301_v58 = vld [vmem:[%s3724_s19 + $0x142] sm:$0xff] }
  0x2a   : > { %v303_v62 = vld [vmem:[%s3724_s19 + $0x15a] sm:$0xff]  ;;  %v302_v63 = vld [vmem:[%s3724_s19 + $0x152] sm:$0xff] }
  0x2d   : > { %461 = vrot.lane.b32.xlu1 %v3781_v12, %s3675_s20  ;;  %459 = vrot.lane.b32.xlu0 %v3784_v13, %s3675_s20 }
  0x31   : > { %465 = vrot.lane.b32.xlu1 %v3791_v14, %s3675_s20  ;;  %463 = vrot.lane.b32.xlu0 %v3794_v15, %s3675_s20 }
  0x35   : > { %469 = vrot.lane.b32.xlu1 %v3801_v16, %s3675_s20  ;;  %467 = vrot.lane.b32.xlu0 %v3804_v17, %s3675_s20 }
  0x39   : > { %473 = vrot.lane.b32.xlu1 %v3811_v18, %s3675_s20  ;;  %471 = vrot.lane.b32.xlu0 %v3814_v19, %s3675_s20 }
  0x3d   : > { %477 = vrot.lane.b32.xlu1 %v3821_v20, %s3675_s20  ;;  %475 = vrot.lane.b32.xlu0 %v3824_v21, %s3675_s20 }
  0x41   : > { %481 = vrot.lane.b32.xlu1 %v3831_v22, %s3675_s20  ;;  %479 = vrot.lane.b32.xlu0 %v3834_v23, %s3675_s20 }
  0x45   : > { %485 = vrot.lane.b32.xlu1 %v3841_v24, %s3675_s20  ;;  %483 = vrot.lane.b32.xlu0 %v3844_v25, %s3675_s20 }
  0x49   : > { %489 = vrot.lane.b32.xlu1 %v3851_v26, %s3675_s20  ;;  %487 = vrot.lane.b32.xlu0 %v3854_v27, %s3675_s20 }
  0x4d   : > { %493 = vrot.lane.b32.xlu1 %v3861_v28, %s3675_s20  ;;  %491 = vrot.lane.b32.xlu0 %v3864_v29, %s3675_s20 }
  0x51   : > { %497 = vrot.lane.b32.xlu1 %v3871_v30, %s3675_s20  ;;  %495 = vrot.lane.b32.xlu0 %v3874_v31, %s3675_s20 }
  0x55   : > { %565 = vrot.lane.b32.xlu1 %v275_v32, %s3676_s21  ;;  %563 = vrot.lane.b32.xlu0 %v274_v33, %s3676_s21  ;;  %v305_v32 = vld [vmem:[%s3724_s19 + $0x172] sm:$0xff]  ;;  %v304_v33 = vld [vmem:[%s3724_s19 + $0x16a] sm:$0xff] }
  0x59   : > { %569 = vrot.lane.b32.xlu1 %v3885_v34, %s3676_s21  ;;  %567 = vrot.lane.b32.xlu0 %v3888_v35, %s3676_s21 }
  0x5d   : > { %573 = vrot.lane.b32.xlu1 %v3895_v36, %s3676_s21  ;;  %571 = vrot.lane.b32.xlu0 %v3898_v37, %s3676_s21 }
  0x61   : > { %577 = vrot.lane.b32.xlu1 %v3905_v38, %s3676_s21  ;;  %575 = vrot.lane.b32.xlu0 %v3908_v39, %s3676_s21 }
  0x65   : > { %581 = vrot.lane.b32.xlu1 %v3915_v40, %s3676_s21  ;;  %579 = vrot.lane.b32.xlu0 %v3918_v41, %s3676_s21 }
  0x69   : > { %585 = vrot.lane.b32.xlu1 %v3925_v42, %s3676_s21  ;;  %583 = vrot.lane.b32.xlu0 %v3928_v43, %s3676_s21 }
  0x6d   : > { %589 = vrot.lane.b32.xlu1 %v3935_v44, %s3676_s21  ;;  %587 = vrot.lane.b32.xlu0 %v3938_v45, %s3676_s21 }
  0x71   : > { %593 = vrot.lane.b32.xlu1 %v3945_v46, %s3676_s21  ;;  %591 = vrot.lane.b32.xlu0 %v3948_v47, %s3676_s21 }
  0x75   : > { %597 = vrot.lane.b32.xlu1 %v3955_v48, %s3676_s21  ;;  %595 = vrot.lane.b32.xlu0 %v3958_v49, %s3676_s21 }
  0x79   : > { %601 = vrot.lane.b32.xlu1 %v3965_v50, %s3676_s21  ;;  %599 = vrot.lane.b32.xlu0 %v3968_v51, %s3676_s21 }
  0x7d   : > { %605 = vrot.lane.b32.xlu1 %v3975_v52, %s3676_s21  ;;  %603 = vrot.lane.b32.xlu0 %v3978_v53, %s3676_s21 }
  0x81   : > { %609 = vrot.lane.b32.xlu1 %v3985_v54, %s3676_s21  ;;  %607 = vrot.lane.b32.xlu0 %v3988_v55, %s3676_s21 }
  0x85   : > { %613 = vrot.lane.b32.xlu1 %v299_v56, %s3676_s21  ;;  %611 = vrot.lane.b32.xlu0 %v3996_v57, %s3676_s21 }
  0x87   : > { %v4003_v60 = vpop.permute.xlu1 %439  ;;  %v4005_v61 = vpop.permute.xlu0 %435 }
  0x88   : > { %5704 = vst [vmem:[#allocation2_spill] sm:$0xff] %v4003_v60  ;;  %5705 = vst [vmem:[#allocation3_spill] sm:$0xff] %v4005_v61  ;;  %v4072_v60 = vld [vmem:[%s3724_s19 + $0x68] sm:$0xff]  ;;  %v4086_v61 = vld [vmem:[%s3724_s19 + $0x80] sm:$0xff] }
  0x89   : > { %617 = vrot.lane.b32.xlu1 %v301_v58, %s3676_s21  ;;  %615 = vrot.lane.b32.xlu0 %v300_v59, %s3676_s21  ;;  %5723 = vst [vmem:[#allocation21_spill] sm:$0xff] %v4072_v60  ;;  %5727 = vst [vmem:[#allocation25_spill] sm:$0xff] %v4086_v61 }
  0x8b   : > { %v4011_v1 = vpop.permute.xlu1 %441  ;;  %v4013_v3 = vpop.permute.xlu0 %437 }
  0x8c   : > { %5706 = vst [vmem:[#allocation4_spill] sm:$0xff] %v4011_v1  ;;  %5707 = vst [vmem:[#allocation5_spill] sm:$0xff] %v4013_v3 }
  0x8d   : > { %621 = vrot.lane.b32.xlu1 %v303_v62, %s3676_s21  ;;  %619 = vrot.lane.b32.xlu0 %v302_v63, %s3676_s21  ;;  %v4030_v62 = vld [vmem:[%s3724_s19 + $0x18] sm:$0xff]  ;;  %v4033_v63 = vld [vmem:[%s3724_s19 + $0x20] sm:$0xff] }
  0x8e   : > { %5712 = vst [vmem:[#allocation10_spill] sm:$0xff] %v4030_v62  ;;  %5713 = vst [vmem:[#allocation11_spill] sm:$0xff] %v4033_v63 }
  0x8f   : > { %v4019_v56 = vpop.permute.xlu1 %445  ;;  %v4021_v58 = vpop.permute.xlu0 %443 }
  0x90   : > { %5708 = vst [vmem:[#allocation6_spill] sm:$0xff] %v4019_v56  ;;  %5709 = vst [vmem:[#allocation7_spill] sm:$0xff] %v4021_v58 }
  0x91   : > { %625 = vrot.lane.b32.xlu1 %v305_v32, %s3676_s21  ;;  %623 = vrot.lane.b32.xlu0 %v304_v33, %s3676_s21 }
  0x93   : > { %v4025_v59 = vpop.permute.xlu1 %449  ;;  %v4027_v1 = vpop.permute.xlu0 %447 }
  0x94   : > { %5710 = vst [vmem:[#allocation8_spill] sm:$0xff] %v4025_v59  ;;  %5711 = vst [vmem:[#allocation9_spill] sm:$0xff] %v4027_v1  ;;  %v4044_v59 = vld [vmem:[%s3724_s19 + $0x38] sm:$0xff]  ;;  %v4047_v1 = vld [vmem:[%s3724_s19 + $0x30] sm:$0xff] }
  0x95   : > { %693 = vrot.lane.b32.xlu1 %v4033_v63, %s3677_s22  ;;  %691 = vrot.lane.b32.xlu0 %v4030_v62, %s3677_s22  ;;  %5716 = vst [vmem:[#allocation14_spill] sm:$0xff] %v4044_v59  ;;  %v4058_v63 = vld [vmem:[%s3724_s19 + $0x50] sm:$0xff] }
  0x96   : > { %5719 = vst [vmem:[#allocation17_spill] sm:$0xff] %v4058_v63 }
  0x97   : > { %v4039_v32 = vpop.permute.xlu1 %453  ;;  %v4041_v33 = vpop.permute.xlu0 %451 }
  0x98   : > { %5714 = vst [vmem:[#allocation12_spill] sm:$0xff] %v4039_v32  ;;  %5715 = vst [vmem:[#allocation13_spill] sm:$0xff] %v4041_v33  ;;  %v4061_v32 = vld [vmem:[%s3724_s19 + $0x48] sm:$0xff] }
  0x99   : > { %697 = vrot.lane.b32.xlu1 %v4044_v59, %s3677_s22  ;;  %695 = vrot.lane.b32.xlu0 %v4047_v1, %s3677_s22  ;;  %5720 = vst [vmem:[#allocation18_spill] sm:$0xff] %v4061_v32  ;;  %v240_v59 = vld [vmem:[%s3724_s19 + $0x168] sm:$0xff] }
  0x9b   : > { %v4053_v58 = vpop.permute.xlu1 %457  ;;  %v4055_v56 = vpop.permute.xlu0 %455 }
  0x9c   : > { %5717 = vst [vmem:[#allocation15_spill] sm:$0xff] %v4053_v58  ;;  %5718 = vst [vmem:[#allocation16_spill] sm:$0xff] %v4055_v56  ;;  %v4075_v58 = vld [vmem:[%s3724_s19 + $0x60] sm:$0xff] }
  0x9d   : > { %701 = vrot.lane.b32.xlu1 %v4058_v63, %s3677_s22  ;;  %699 = vrot.lane.b32.xlu0 %v4061_v32, %s3677_s22  ;;  %5724 = vst [vmem:[#allocation22_spill] sm:$0xff] %v4075_v58  ;;  %v234_v63 = vld [vmem:[%s3724_s19 + $0x120] sm:$0xff]  ;;  %v238_v32 = vld [vmem:[%s3724_s19 + $0x150] sm:$0xff] }
  0x9f   : > { %v4067_v33 = vpop.permute.xlu1 %461  ;;  %v4069_v62 = vpop.permute.xlu0 %459 }
  0xa0   : > { %5721 = vst [vmem:[#allocation19_spill] sm:$0xff] %v4067_v33  ;;  %5722 = vst [vmem:[#allocation20_spill] sm:$0xff] %v4069_v62  ;;  %v4089_v33 = vld [vmem:[%s3724_s19 + $0x78] sm:$0xff] }
  0xa1   : > { %705 = vrot.lane.b32.xlu1 %v4072_v60, %s3677_s22  ;;  %703 = vrot.lane.b32.xlu0 %v4075_v58, %s3677_s22  ;;  %5728 = vst [vmem:[#allocation26_spill] sm:$0xff] %v4089_v33  ;;  %v4100_v58 = vld [vmem:[%s3724_s19 + $0x98] sm:$0xff] }
  0xa2   : > { %5731 = vst [vmem:[#allocation29_spill] sm:$0xff] %v4100_v58 }
  0xa3   : > { %v4081_v56 = vpop.permute.xlu1 %465  ;;  %v4083_v3 = vpop.permute.xlu0 %463 }
  0xa4   : > { %5725 = vst [vmem:[#allocation23_spill] sm:$0xff] %v4081_v56  ;;  %5726 = vst [vmem:[#allocation24_spill] sm:$0xff] %v4083_v3  ;;  %v4103_v56 = vld [vmem:[%s3724_s19 + $0x90] sm:$0xff] }
  0xa5   : > { %709 = vrot.lane.b32.xlu1 %v4086_v61, %s3677_s22  ;;  %707 = vrot.lane.b32.xlu0 %v4089_v33, %s3677_s22  ;;  %5732 = vst [vmem:[#allocation30_spill] sm:$0xff] %v4103_v56  ;;  %v4114_v33 = vld [vmem:[%s3724_s19 + $0xb0] sm:$0xff] }
  0xa6   : > { %5735 = vst [vmem:[#allocation33_spill] sm:$0xff] %v4114_v33 }
  0xa7   : > { %v4095_v62 = vpop.permute.xlu1 %469  ;;  %v4097_v60 = vpop.permute.xlu0 %467 }
  0xa8   : > { %5729 = vst [vmem:[#allocation27_spill] sm:$0xff] %v4095_v62  ;;  %5730 = vst [vmem:[#allocation28_spill] sm:$0xff] %v4097_v60  ;;  %v4117_v62 = vld [vmem:[%s3724_s19 + $0xa8] sm:$0xff] }
  0xa9   : > { %713 = vrot.lane.b32.xlu1 %v4100_v58, %s3677_s22  ;;  %711 = vrot.lane.b32.xlu0 %v4103_v56, %s3677_s22  ;;  %5736 = vst [vmem:[#allocation34_spill] sm:$0xff] %v4117_v62  ;;  %v4128_v58 = vld [vmem:[%s3724_s19 + $0xc8] sm:$0xff] }
  0xaa   : > { %5739 = vst [vmem:[#allocation37_spill] sm:$0xff] %v4128_v58 }
  0xab   : > { %v4109_v3 = vpop.permute.xlu1 %473  ;;  %v4111_v61 = vpop.permute.xlu0 %471 }
  0xac   : > { %5733 = vst [vmem:[#allocation31_spill] sm:$0xff] %v4109_v3  ;;  %5734 = vst [vmem:[#allocation32_spill] sm:$0xff] %v4111_v61  ;;  %v4131_v3 = vld [vmem:[%s3724_s19 + $0xc0] sm:$0xff] }
  0xad   : > { %717 = vrot.lane.b32.xlu1 %v4114_v33, %s3677_s22  ;;  %715 = vrot.lane.b32.xlu0 %v4117_v62, %s3677_s22  ;;  %5740 = vst [vmem:[#allocation38_spill] sm:$0xff] %v4131_v3  ;;  %v4142_v33 = vld [vmem:[%s3724_s19 + $0xe0] sm:$0xff] }
  0xae   : > { %5743 = vst [vmem:[#allocation41_spill] sm:$0xff] %v4142_v33 }
  0xaf   : > { %v4123_v60 = vpop.permute.xlu1 %477  ;;  %v4125_v56 = vpop.permute.xlu0 %475 }
  0xb0   : > { %5737 = vst [vmem:[#allocation35_spill] sm:$0xff] %v4123_v60  ;;  %5738 = vst [vmem:[#allocation36_spill] sm:$0xff] %v4125_v56  ;;  %v4145_v60 = vld [vmem:[%s3724_s19 + $0xd8] sm:$0xff] }
  0xb1   : > { %721 = vrot.lane.b32.xlu1 %v4128_v58, %s3677_s22  ;;  %719 = vrot.lane.b32.xlu0 %v4131_v3, %s3677_s22  ;;  %5744 = vst [vmem:[#allocation42_spill] sm:$0xff] %v4145_v60  ;;  %v4156_v58 = vld [vmem:[%s3724_s19 + $0xf8] sm:$0xff] }
  0xb2   : > { %5747 = vst [vmem:[#allocation45_spill] sm:$0xff] %v4156_v58 }
  0xb3   : > { %v4137_v61 = vpop.permute.xlu1 %481  ;;  %v4139_v62 = vpop.permute.xlu0 %479 }
  0xb4   : > { %5741 = vst [vmem:[#allocation39_spill] sm:$0xff] %v4137_v61  ;;  %5742 = vst [vmem:[#allocation40_spill] sm:$0xff] %v4139_v62  ;;  %v4159_v61 = vld [vmem:[%s3724_s19 + $0xf0] sm:$0xff] }
  0xb5   : > { %725 = vrot.lane.b32.xlu1 %v4142_v33, %s3677_s22  ;;  %723 = vrot.lane.b32.xlu0 %v4145_v60, %s3677_s22  ;;  %5748 = vst [vmem:[#allocation46_spill] sm:$0xff] %v4159_v61  ;;  %v233_v33 = vld [vmem:[%s3724_s19 + $0x110] sm:$0xff] }
  0xb7   : > { %v4151_v56 = vpop.permute.xlu1 %485  ;;  %v4153_v3 = vpop.permute.xlu0 %483 }
  0xb8   : > { %5745 = vst [vmem:[#allocation43_spill] sm:$0xff] %v4151_v56  ;;  %5746 = vst [vmem:[#allocation44_spill] sm:$0xff] %v4153_v3  ;;  %v4171_v56 = vld [vmem:[%s3724_s19 + $0x108] sm:$0xff] }
  0xb9   : > { %729 = vrot.lane.b32.xlu1 %v4156_v58, %s3677_s22  ;;  %727 = vrot.lane.b32.xlu0 %v4159_v61, %s3677_s22  ;;  %5751 = vst [vmem:[#allocation49_spill] sm:$0xff] %v4171_v56  ;;  %v235_v61 = vld [vmem:[%s3724_s19 + $0x128] sm:$0xff] }
  0xbb   : > { %v4165_v62 = vpop.permute.xlu1 %489  ;;  %v4167_v60 = vpop.permute.xlu0 %487 }
  0xbc   : > { %5749 = vst [vmem:[#allocation47_spill] sm:$0xff] %v4165_v62  ;;  %5750 = vst [vmem:[#allocation48_spill] sm:$0xff] %v4167_v60  ;;  %v237_v60 = vld [vmem:[%s3724_s19 + $0x140] sm:$0xff] }
  0xbd   : > { %733 = vrot.lane.b32.xlu1 %v233_v33, %s3677_s22  ;;  %731 = vrot.lane.b32.xlu0 %v4171_v56, %s3677_s22  ;;  %v236_v56 = vld [vmem:[%s3724_s19 + $0x138] sm:$0xff] }
  0xbf   : > { %v4176_v3 = vpop.permute.xlu1 %493  ;;  %v4178_v58 = vpop.permute.xlu0 %491 }
  0xc0   : > { %5752 = vst [vmem:[#allocation50_spill] sm:$0xff] %v4176_v3  ;;  %5753 = vst [vmem:[#allocation51_spill] sm:$0xff] %v4178_v58 }
  0xc1   : > { %737 = vrot.lane.b32.xlu1 %v235_v61, %s3677_s22  ;;  %735 = vrot.lane.b32.xlu0 %v234_v63, %s3677_s22  ;;  %v239_v61 = vld [vmem:[%s3724_s19 + $0x158] sm:$0xff] }
  0xc3   : > { %v4184_v62 = vpop.permute.xlu1 %497  ;;  %v4186_v33 = vpop.permute.xlu0 %495 }
  0xc4   : > { %5754 = vst [vmem:[#allocation52_spill] sm:$0xff] %v4184_v62  ;;  %5755 = vst [vmem:[#allocation53_spill] sm:$0xff] %v4186_v33  ;;  %v241_v33 = vld [vmem:[%s3724_s19 + $0x170] sm:$0xff] }
  0xc5   : > { %741 = vrot.lane.b32.xlu1 %v237_v60, %s3677_s22  ;;  %739 = vrot.lane.b32.xlu0 %v236_v56, %s3677_s22  ;;  %v3065_v60 = vld [vmem:[%s3724_s19 + $0x188] sm:$0xff]  ;;  %v3064_v56 = vld [vmem:[%s3724_s19 + $0x180] sm:$0xff] }
  0xc7   : > { %v4192_v3 = vpop.permute.xlu1 %565  ;;  %v4194_v58 = vpop.permute.xlu0 %563 }
  0xc8   : > { %5756 = vst [vmem:[#allocation54_spill] sm:$0xff] %v4192_v3  ;;  %5757 = vst [vmem:[#allocation55_spill] sm:$0xff] %v4194_v58 }
  0xc9   : > { %745 = vrot.lane.b32.xlu1 %v239_v61, %s3677_s22  ;;  %743 = vrot.lane.b32.xlu0 %v238_v32, %s3677_s22 }
  0xcb   : > { %v4200_v63 = vpop.permute.xlu1 %569  ;;  %v4202_v62 = vpop.permute.xlu0 %567 }
  0xcd   : > { %749 = vrot.lane.b32.xlu1 %v241_v33, %s3677_s22  ;;  %747 = vrot.lane.b32.xlu0 %v240_v59, %s3677_s22 }
  0xcf   : > { %v4210_v3 = vpop.permute.xlu1 %573  ;;  %v4212_v58 = vpop.permute.xlu0 %571 }
  0xd1   : > { %753 = vrot.lane.b32.xlu1 %v3065_v60, %s3677_s22  ;;  %751 = vrot.lane.b32.xlu0 %v3064_v56, %s3677_s22 }
  0xd3   : > { %v4216_v32 = vpop.permute.xlu1 %577  ;;  %v4218_v61 = vpop.permute.xlu0 %575 }
  0xd5   : > { %821 = vrot.lane.b32.xlu1 %v3734_v2, %s3678_s23  ;;  %819 = vrot.lane.b32.xlu0 %v3727_v0, %s3678_s23 }
  0xd7   : > { %v4224_v59 = vpop.permute.xlu1 %581  ;;  %v4226_v33 = vpop.permute.xlu0 %579 }
  0xd9   : > { %825 = vrot.lane.b32.xlu1 %v3741_v4, %s3678_s23  ;;  %823 = vrot.lane.b32.xlu0 %v3744_v5, %s3678_s23 }
  0xdb   : > { %v4232_v60 = vpop.permute.xlu1 %585  ;;  %v4234_v56 = vpop.permute.xlu0 %583 }
  0xdd   : > { %829 = vrot.lane.b32.xlu1 %v3751_v6, %s3678_s23  ;;  %827 = vrot.lane.b32.xlu0 %v3754_v7, %s3678_s23 }
  0xdf   : > { %v4240_v0 = vpop.permute.xlu1 %589  ;;  %v4242_v2 = vpop.permute.xlu0 %587 }
  0xe1   : > { %833 = vrot.lane.b32.xlu1 %v3761_v8, %s3678_s23  ;;  %831 = vrot.lane.b32.xlu0 %v3764_v9, %s3678_s23 }
  0xe3   : > { %v4248_v4 = vpop.permute.xlu1 %593  ;;  %v4250_v5 = vpop.permute.xlu0 %591 }
  0xe5   : > { %837 = vrot.lane.b32.xlu1 %v3771_v10, %s3678_s23  ;;  %835 = vrot.lane.b32.xlu0 %v3774_v11, %s3678_s23 }
  0xe7   : > { %v4256_v6 = vpop.permute.xlu1 %597  ;;  %v4258_v7 = vpop.permute.xlu0 %595 }
  0xe8   : > { %5758 = vst [vmem:[#allocation56_spill] sm:$0xff] %v4256_v6  ;;  %5759 = vst [vmem:[#allocation57_spill] sm:$0xff] %v4258_v7  ;;  %v5815_v7 = vld [vmem:[#allocation54_spill] sm:$0xff] }
  0xe9   : > { %841 = vrot.lane.b32.xlu1 %v3781_v12, %s3678_s23  ;;  %839 = vrot.lane.b32.xlu0 %v3784_v13, %s3678_s23 }
  0xeb   : > { %v4264_v8 = vpop.permute.xlu1 %601  ;;  %v4266_v9 = vpop.permute.xlu0 %599 }
  0xec   : > { %5760 = vst [vmem:[#allocation58_spill] sm:$0xff] %v4264_v8  ;;  %5761 = vst [vmem:[#allocation59_spill] sm:$0xff] %v4266_v9  ;;  %v5801_v8 = vld [vmem:[#allocation22_spill] sm:$0xff] }
  0xed   : > { %845 = vrot.lane.b32.xlu1 %v3791_v14, %s3678_s23  ;;  %843 = vrot.lane.b32.xlu0 %v3794_v15, %s3678_s23 }
  0xef   : > { %v4272_v10 = vpop.permute.xlu1 %605  ;;  %v4274_v11 = vpop.permute.xlu0 %603 }
  0xf0   : > { %5762 = vst [vmem:[#allocation60_spill] sm:$0xff] %v4272_v10  ;;  %5763 = vst [vmem:[#allocation61_spill] sm:$0xff] %v4274_v11  ;;  %v3326_v10 = vld [vmem:[%s3724_s19 + $0x52] sm:$0xff] }
  0xf1   : > { %849 = vrot.lane.b32.xlu1 %v3801_v16, %s3678_s23  ;;  %847 = vrot.lane.b32.xlu0 %v3804_v17, %s3678_s23 }
  0xf3   : > { %v4280_v12 = vpop.permute.xlu1 %609  ;;  %v4282_v13 = vpop.permute.xlu0 %607 }
  0xf4   : > { %5764 = vst [vmem:[#allocation62_spill] sm:$0xff] %v4280_v12  ;;  %5765 = vst [vmem:[#allocation63_spill] sm:$0xff] %v4282_v13 }
  0xf5   : > { %853 = vrot.lane.b32.xlu1 %v3811_v18, %s3678_s23  ;;  %851 = vrot.lane.b32.xlu0 %v3814_v19, %s3678_s23 }
  0xf7   : > { %v4288_v14 = vpop.permute.xlu1 %613  ;;  %v4290_v15 = vpop.permute.xlu0 %611 }
  0xf8   : > { %5766 = vst [vmem:[#allocation64_spill] sm:$0xff] %v4288_v14  ;;  %5767 = vst [vmem:[#allocation65_spill] sm:$0xff] %v4290_v15 }
  0xf9   : > { %857 = vrot.lane.b32.xlu1 %v3821_v20, %s3678_s23  ;;  %855 = vrot.lane.b32.xlu0 %v3824_v21, %s3678_s23  ;;  %v1208_v20 = vld [vmem:[%s5674_s1] sm:$0xff]  ;;  %v1209_v21 = vld [vmem:[%s5674_s1 + $0x8] sm:$0xff] }
  0xfb   : > { %v4296_v16 = vpop.permute.xlu1 %617  ;;  %v4298_v17 = vpop.permute.xlu0 %615 }
  0xfc   : > { %5768 = vst [vmem:[#allocation66_spill] sm:$0xff] %v4296_v16  ;;  %5769 = vst [vmem:[#allocation67_spill] sm:$0xff] %v4298_v17 }
  0xfd   : > { %861 = vrot.lane.b32.xlu1 %v3831_v22, %s3678_s23  ;;  %859 = vrot.lane.b32.xlu0 %v3834_v23, %s3678_s23  ;;  %v3604_v22 = vpack.c.bf16 %v1209_v21, %v1208_v20  ;;  %v1210_v20 = vld [vmem:[%s5674_s1 + $0x10] sm:$0xff] }
  0xfe   : > { %v3097_v21 = vld [vmem:[%s3724_s19 + $0x189] sm:$0xff] }
  0xff   : > { %v4304_v18 = vpop.permute.xlu1 %621  ;;  %v4306_v19 = vpop.permute.xlu0 %619  ;;  %3605 = vmatprep.subr.bf16.mxu0 %v3604_v22 }
 0x100   : > { %5770 = vst [vmem:[#allocation68_spill] sm:$0xff] %v4304_v18  ;;  %5771 = vst [vmem:[#allocation69_spill] sm:$0xff] %v4306_v19  ;;  %3607 = vmatpush3.bf16.msra.mxu0 %v3604_v22  ;;  %v3096_v22 = vld [vmem:[%s3724_s19 + $0x181] sm:$0xff] }
 0x101   : > { %865 = vrot.lane.b32.xlu1 %v3841_v24, %s3678_s23  ;;  %863 = vrot.lane.b32.xlu0 %v3844_v25, %s3678_s23 }
 0x102   : > { %3500 = vmatprep.subr.mxu0 %v1210_v20 }
 0x103   : > { %v4318_v23 = vpop.permute.xlu1 %625  ;;  %v4320_v18 = vpop.permute.xlu0 %623 }
 0x104   : > { %5772 = vst [vmem:[#allocation70_spill] sm:$0xff] %v4318_v23  ;;  %5773 = vst [vmem:[#allocation71_spill] sm:$0xff] %v4320_v18  ;;  %3501 = vmatpush3.msra.mxu0 %v1210_v20 }
 0x105   : > { %869 = vrot.lane.b32.xlu1 %v3851_v26, %s3678_s23  ;;  %867 = vrot.lane.b32.xlu0 %v3854_v27, %s3678_s23 }
 0x107   : > { %v4326_v24 = vpop.permute.xlu1 %693  ;;  %v4328_v25 = vpop.permute.xlu0 %691 }
 0x109   : > { %873 = vrot.lane.b32.xlu1 %v3861_v28, %s3678_s23  ;;  %871 = vrot.lane.b32.xlu0 %v3864_v29, %s3678_s23 }
 0x10b   : > { %v4337_v26 = vpop.permute.xlu1 %697  ;;  %v4339_v27 = vpop.permute.xlu0 %695 }
 0x10d   : > { %877 = vrot.lane.b32.xlu1 %v3871_v30, %s3678_s23  ;;  %875 = vrot.lane.b32.xlu0 %v3874_v31, %s3678_s23 }
 0x10f   : > { %v4347_v23 = vpop.permute.xlu1 %701  ;;  %v4349_v18 = vpop.permute.xlu0 %699 }
 0x111   : > { %881 = vrot.lane.b32.xlu1 %v3097_v21, %s3678_s23  ;;  %879 = vrot.lane.b32.xlu0 %v3096_v22, %s3678_s23 }
 0x113   : > { %v4353_v28 = vpop.permute.xlu1 %705  ;;  %v4355_v29 = vpop.permute.xlu0 %703 }
 0x115   : > { %949 = vrot.lane.b32.xlu1 %v3885_v34, %s3679_s30  ;;  %947 = vrot.lane.b32.xlu0 %v3888_v35, %s3679_s30 }
 0x117   : > { %v4361_v30 = vpop.permute.xlu1 %709  ;;  %v4363_v31 = vpop.permute.xlu0 %707 }
 0x119   : > { %953 = vrot.lane.b32.xlu1 %v3895_v36, %s3679_s30  ;;  %951 = vrot.lane.b32.xlu0 %v3898_v37, %s3679_s30 }
 0x11b   : > { %v4369_v20 = vpop.permute.xlu1 %713  ;;  %v4371_v21 = vpop.permute.xlu0 %711 }
 0x11d   : > { %957 = vrot.lane.b32.xlu1 %v3905_v38, %s3679_s30  ;;  %955 = vrot.lane.b32.xlu0 %v3908_v39, %s3679_s30 }
 0x11f   : > { %v4377_v22 = vpop.permute.xlu1 %717  ;;  %v4379_v19 = vpop.permute.xlu0 %715 }
 0x121   : > { %961 = vrot.lane.b32.xlu1 %v3915_v40, %s3679_s30  ;;  %959 = vrot.lane.b32.xlu0 %v3918_v41, %s3679_s30 }
 0x123   : > { %v4385_v16 = vpop.permute.xlu1 %721  ;;  %v4387_v17 = vpop.permute.xlu0 %719 }
 0x125   : > { %965 = vrot.lane.b32.xlu1 %v3925_v42, %s3679_s30  ;;  %963 = vrot.lane.b32.xlu0 %v3928_v43, %s3679_s30 }
 0x127   : > { %v4393_v38 = vpop.permute.xlu1 %725  ;;  %v4395_v39 = vpop.permute.xlu0 %723 }
 0x128   : > { %5774 = vst [vmem:[#allocation72_spill] sm:$0xff] %v4393_v38  ;;  %5775 = vst [vmem:[#allocation73_spill] sm:$0xff] %v4395_v39 }
 0x129   : > { %969 = vrot.lane.b32.xlu1 %v3935_v44, %s3679_s30  ;;  %967 = vrot.lane.b32.xlu0 %v3938_v45, %s3679_s30 }
 0x12b   : > { %v4401_v40 = vpop.permute.xlu1 %729  ;;  %v4403_v41 = vpop.permute.xlu0 %727 }
 0x12c   : > { %5776 = vst [vmem:[#allocation74_spill] sm:$0xff] %v4401_v40  ;;  %5777 = vst [vmem:[#allocation75_spill] sm:$0xff] %v4403_v41 }
 0x12d   : > { %973 = vrot.lane.b32.xlu1 %v3945_v46, %s3679_s30  ;;  %971 = vrot.lane.b32.xlu0 %v3948_v47, %s3679_s30 }
 0x12f   : > { %v4409_v42 = vpop.permute.xlu1 %733  ;;  %v4411_v43 = vpop.permute.xlu0 %731 }
 0x130   : > { %5778 = vst [vmem:[#allocation76_spill] sm:$0xff] %v4409_v42  ;;  %5779 = vst [vmem:[#allocation77_spill] sm:$0xff] %v4411_v43 }
 0x131   : > { %977 = vrot.lane.b32.xlu1 %v3955_v48, %s3679_s30  ;;  %975 = vrot.lane.b32.xlu0 %v3958_v49, %s3679_s30 }
 0x133   : > { %v4417_v44 = vpop.permute.xlu1 %737  ;;  %v4419_v45 = vpop.permute.xlu0 %735 }
 0x134   : > { %5780 = vst [vmem:[#allocation78_spill] sm:$0xff] %v4417_v44  ;;  %5781 = vst [vmem:[#allocation79_spill] sm:$0xff] %v4419_v45  ;;  %v3293_v44 = vld [vmem:[%s3724_s19 + $0x49] sm:$0xff] }
 0x135   : > { %981 = vrot.lane.b32.xlu1 %v3965_v50, %s3679_s30  ;;  %979 = vrot.lane.b32.xlu0 %v3968_v51, %s3679_s30  ;;  %v3195_v50 = vld [vmem:[%s3724_s19 + $0x19] sm:$0xff] }
 0x137   : > { %v4425_v46 = vpop.permute.xlu1 %741  ;;  %v4427_v47 = vpop.permute.xlu0 %739 }
 0x138   : > { %5782 = vst [vmem:[#allocation80_spill] sm:$0xff] %v4425_v46  ;;  %5783 = vst [vmem:[#allocation81_spill] sm:$0xff] %v4427_v47 }
 0x139   : > { %985 = vrot.lane.b32.xlu1 %v3975_v52, %s3679_s30  ;;  %983 = vrot.lane.b32.xlu0 %v3978_v53, %s3679_s30  ;;  %v3196_v52 = vld [vmem:[%s3724_s19 + $0x21] sm:$0xff] }
 0x13b   : > { %v4433_v48 = vpop.permute.xlu1 %745  ;;  %v4435_v49 = vpop.permute.xlu0 %743 }
 0x13c   : > { %5784 = vst [vmem:[#allocation82_spill] sm:$0xff] %v4433_v48  ;;  %5785 = vst [vmem:[#allocation83_spill] sm:$0xff] %v4435_v49 }
 0x13d   : > { %989 = vrot.lane.b32.xlu1 %v3985_v54, %s3679_s30  ;;  %987 = vrot.lane.b32.xlu0 %v3988_v55, %s3679_s30  ;;  %v3355_v54 = vld [vmem:[%s5674_s1 + $0x18] sm:$0xff]  ;;  %v3356_v55 = vld [vmem:[%s5674_s1 + $0x20] sm:$0xff] }
 0x13f   : > { %v4442_v51 = vpop.permute.xlu1 %749  ;;  %v4444_v46 = vpop.permute.xlu0 %747 }
 0x140   : > { %5786 = vst [vmem:[#allocation84_spill] sm:$0xff] %v4442_v51  ;;  %5787 = vst [vmem:[#allocation85_spill] sm:$0xff] %v4444_v46 }
 0x141   : > { %1797 = vrot.lane.b32.xlu1 %v3195_v50, %s3675_s20  ;;  %991 = vrot.lane.b32.xlu0 %v3996_v57, %s3679_s30 }
 0x143   : > { %v4450_v53 = vpop.permute.xlu1 %753  ;;  %v4452_v48 = vpop.permute.xlu0 %751 }
 0x144   : > { %5788 = vst [vmem:[#allocation86_spill] sm:$0xff] %v4450_v53  ;;  %5789 = vst [vmem:[#allocation87_spill] sm:$0xff] %v4452_v48  ;;  %v3608_v53 = vpack.c.bf16 %v3356_v55, %v3355_v54  ;;  %v5790_v54 = vld [vmem:[#allocation14_spill] sm:$0xff] }
 0x145   : > { %1925 = vrot.lane.b32.xlu1 %v3888_v35, %s3676_s21  ;;  %1799 = vrot.lane.b32.xlu0 %v3196_v52, %s3675_s20  ;;  %v3291_v35 = vld [vmem:[%s3724_s19 + $0x31] sm:$0xff]  ;;  %v3357_v52 = vld [vmem:[%s5674_s1 + $0x28] sm:$0xff] }
 0x146   : > { %3609 = vmatprep.subr.bf16.mxu1 %v3608_v53  ;;  %v3292_v55 = vld [vmem:[%s3724_s19 + $0x39] sm:$0xff] }
 0x147   : > { %v4463_v57 = vpop.permute.xlu1 %821  ;;  %v4465_v50 = vpop.permute.xlu0 %819  ;;  %3611 = vmatpush3.bf16.msra.mxu1 %v3608_v53 }
 0x148   : > { %3554 = vmatprep.subr.mxu1 %v3357_v52 }
 0x149   : > { %2053 = vrot.lane.b32.xlu1 %v4047_v1, %s3677_s22  ;;  %1927 = vrot.lane.b32.xlu0 %v3885_v34, %s3676_s21 }
 0x14b   : > { %v4475_v48 = vpop.permute.xlu1 %825  ;;  %v4477_v51 = vpop.permute.xlu0 %823  ;;  %3555 = vmatpush3.msra.mxu1 %v3357_v52 }
 0x14d   : > { %2181 = vrot.lane.b32.xlu1 %v3291_v35, %s3678_s23  ;;  %2055 = vrot.lane.b32.xlu0 %v5790_v54, %s3677_s22 }
 0x14f   : > { %v4483_v34 = vpop.permute.xlu1 %829  ;;  %v4485_v46 = vpop.permute.xlu0 %827 }
 0x151   : > { %2183 = vrot.lane.b32.xlu1 %v3292_v55, %s3678_s23  ;;  %1801 = vrot.lane.b32.xlu0 %v3291_v35, %s3675_s20  ;;  %v3230_v35 = vld [vmem:[%s3724_s19 + $0x3a] sm:$0xff] }
 0x153   : > { %v4489_v49 = vpop.permute.xlu1 %833  ;;  %v4491_v53 = vpop.permute.xlu0 %831 }
 0x155   : > { %1803 = vrot.lane.b32.xlu1 %v3292_v55, %s3675_s20  ;;  %2309 = vrot.lane.b32.xlu0 %v3898_v37, %s3679_s30  ;;  %v5791_v55 = vld [vmem:[#allocation18_spill] sm:$0xff] }
 0x157   : > { %v4496_v14 = vpop.permute.xlu1 %837  ;;  %v4498_v47 = vpop.permute.xlu0 %835 }
 0x159   : > { %2311 = vrot.lane.b32.xlu1 %v3895_v36, %s3679_s30  ;;  %1929 = vrot.lane.b32.xlu0 %v3898_v37, %s3676_s21  ;;  %v5792_v36 = vld [vmem:[#allocation17_spill] sm:$0xff] }
 0x15a   : > { %v3294_v37 = vld [vmem:[%s3724_s19 + $0x51] sm:$0xff] }
 0x15b   : > { %v4505_v52 = vpop.permute.xlu1 %841  ;;  %v4507_v15 = vpop.permute.xlu0 %839 }
 0x15d   : > { %2057 = vrot.lane.b32.xlu1 %v5791_v55, %s3677_s22  ;;  %1931 = vrot.lane.b32.xlu0 %v3230_v35, %s3676_s21  ;;  %v3325_v35 = vld [vmem:[%s3724_s19 + $0x4a] sm:$0xff] }
 0x15f   : > { %v4513_v12 = vpop.permute.xlu1 %845  ;;  %v4515_v45 = vpop.permute.xlu0 %843 }
 0x161   : > { %2185 = vrot.lane.b32.xlu1 %v3293_v44, %s3678_s23  ;;  %2059 = vrot.lane.b32.xlu0 %v5792_v36, %s3677_s22 }
 0x163   : > { %v4521_v13 = vpop.permute.xlu1 %849  ;;  %v4523_v43 = vpop.permute.xlu0 %847 }
 0x164   : > { %5793 = vst [vmem:[#allocation14_spill] sm:$0xff] %v4521_v13  ;;  %5794 = vst [vmem:[#allocation18_spill] sm:$0xff] %v4523_v43  ;;  %v5816_v43 = vld [vmem:[#allocation55_spill] sm:$0xff] }
 0x165   : > { %2187 = vrot.lane.b32.xlu1 %v3294_v37, %s3678_s23  ;;  %1805 = vrot.lane.b32.xlu0 %v3293_v44, %s3675_s20 }
 0x167   : > { %v4528_v42 = vpop.permute.xlu1 %853  ;;  %v4530_v11 = vpop.permute.xlu0 %851 }
 0x168   : > { %5795 = vst [vmem:[#allocation17_spill] sm:$0xff] %v4528_v42  ;;  %5796 = vst [vmem:[#allocation88_spill] sm:$0xff] %v4530_v11  ;;  %v3328_v42 = vld [vmem:[%s3724_s19 + $0x6a] sm:$0xff] }
 0x169   : > { %1807 = vrot.lane.b32.xlu1 %v3294_v37, %s3675_s20  ;;  %2313 = vrot.lane.b32.xlu0 %v3325_v35, %s3679_s30  ;;  %v3295_v37 = vld [vmem:[%s3724_s19 + $0x61] sm:$0xff] }
 0x16b   : > { %v4535_v41 = vpop.permute.xlu1 %857  ;;  %v4537_v40 = vpop.permute.xlu0 %855 }
 0x16c   : > { %5797 = vst [vmem:[#allocation89_spill] sm:$0xff] %v4535_v41  ;;  %5798 = vst [vmem:[#allocation90_spill] sm:$0xff] %v4537_v40  ;;  %v5804_v40 = vld [vmem:[#allocation21_spill] sm:$0xff] }
 0x16d   : > { %2315 = vrot.lane.b32.xlu1 %v3326_v10, %s3679_s30  ;;  %1933 = vrot.lane.b32.xlu0 %v3325_v35, %s3676_s21  ;;  %v3296_v35 = vld [vmem:[%s3724_s19 + $0x69] sm:$0xff] }
 0x16f   : > { %v4541_v44 = vpop.permute.xlu1 %861  ;;  %v4543_v9 = vpop.permute.xlu0 %859 }
 0x170   : > { %5799 = vst [vmem:[#allocation91_spill] sm:$0xff] %v4541_v44  ;;  %5800 = vst [vmem:[#allocation92_spill] sm:$0xff] %v4543_v9 }
 0x171   : > { %2061 = vrot.lane.b32.xlu1 %v5801_v8, %s3677_s22  ;;  %1935 = vrot.lane.b32.xlu0 %v3326_v10, %s3676_s21  ;;  %v3327_v10 = vld [vmem:[%s3724_s19 + $0x62] sm:$0xff] }
 0x173   : > { %v4549_v11 = vpop.permute.xlu1 %865  ;;  %v4551_v41 = vpop.permute.xlu0 %863 }
 0x174   : > { %5802 = vst [vmem:[#allocation22_spill] sm:$0xff] %v4549_v11  ;;  %5803 = vst [vmem:[#allocation93_spill] sm:$0xff] %v4551_v41 }
 0x175   : > { %2189 = vrot.lane.b32.xlu1 %v3295_v37, %s3678_s23  ;;  %2063 = vrot.lane.b32.xlu0 %v5804_v40, %s3677_s22 }
 0x177   : > { %v4557_v9 = vpop.permute.xlu1 %869  ;;  %v4559_v44 = vpop.permute.xlu0 %867 }
 0x178   : > { %5805 = vst [vmem:[#allocation21_spill] sm:$0xff] %v4557_v9  ;;  %5806 = vst [vmem:[#allocation94_spill] sm:$0xff] %v4559_v44  ;;  %v210_v9 = vld [vmem:[%s3724_s19] sm:$0xff]  ;;  %v211_v44 = vld [vmem:[%s3724_s19 + $0x8] sm:$0xff] }
 0x179   : > { %2191 = vrot.lane.b32.xlu1 %v3296_v35, %s3678_s23  ;;  %1809 = vrot.lane.b32.xlu0 %v3295_v37, %s3675_s20 }
 0x17b   : > { %v4564_v11 = vpop.permute.xlu1 %873  ;;  %v4566_v41 = vpop.permute.xlu0 %871 }
 0x17c   : > { %5807 = vst [vmem:[#allocation95_spill] sm:$0xff] %v4564_v11  ;;  %5808 = vst [vmem:[#allocation96_spill] sm:$0xff] %v4566_v41  ;;  %v5813_v11 = vld [vmem:[#allocation3_spill] sm:$0xff] }
 0x17d   : > { %1811 = vrot.lane.b32.xlu1 %v3296_v35, %s3675_s20  ;;  %2317 = vrot.lane.b32.xlu0 %v3327_v10, %s3679_s30  ;;  %v1044_v41 = vsel %vm1043_vm0, %v210_v9, %v5813_v11  ;;  %v3297_v11 = vld [vmem:[%s3724_s19 + $0x79] sm:$0xff] }
 0x17e   : > { %v1077_v13 = vsel %vm1076_vm1, %v1044_v41, %v5816_v43  ;;  %v5818_v43 = vld [vmem:[#allocation2_spill] sm:$0xff] }
 0x17f   : > { %v4571_v39 = vpop.permute.xlu1 %877  ;;  %v4573_v38 = vpop.permute.xlu0 %875  ;;  %v1110_v9 = vsel %vm1109_vm2, %v1077_v13, %v4328_v25 }
 0x180   : > { %5809 = vst [vmem:[#allocation97_spill] sm:$0xff] %v4571_v39  ;;  %5810 = vst [vmem:[#allocation98_spill] sm:$0xff] %v4573_v38  ;;  %v5814_v39 = vld [vmem:[#allocation5_spill] sm:$0xff] }
 0x181   : > { %2319 = vrot.lane.b32.xlu1 %v3328_v42, %s3679_s30  ;;  %1937 = vrot.lane.b32.xlu0 %v3327_v10, %s3676_s21  ;;  %v1045_v38 = vsel %vm1043_vm0, %v211_v44, %v5814_v39  ;;  %v5817_v10 = vld [vmem:[#allocation26_spill] sm:$0xff] }
 0x182   : > { %v1078_v6 = vsel %vm1076_vm1, %v1045_v38, %v5815_v7  ;;  %v1143_v7 = vsel %vm1142_vm3, %v1110_v9, %v4465_v50 }
 0x183   : > { %v4579_v37 = vpop.permute.xlu1 %881  ;;  %v4581_v35 = vpop.permute.xlu0 %879 }
 0x184   : > { %5811 = vst [vmem:[#allocation99_spill] sm:$0xff] %v4579_v37  ;;  %5812 = vst [vmem:[#allocation100_spill] sm:$0xff] %v4581_v35  ;;  %v1111_v37 = vsel %vm1109_vm2, %v1078_v6, %v4326_v24  ;;  %v5820_v35 = vld [vmem:[#allocation4_spill] sm:$0xff]  ;;  %v5821_v6 = vld [vmem:[#allocation11_spill] sm:$0xff] }
 0x185   : > { %2065 = vrot.lane.b32.xlu1 %v5817_v10, %s3677_s22  ;;  %1939 = vrot.lane.b32.xlu0 %v3328_v42, %s3676_s21  ;;  %v1144_v39 = vsel %vm1142_vm3, %v1111_v37, %v4463_v57  ;;  %v5819_v42 = vld [vmem:[#allocation10_spill] sm:$0xff]  ;;  %v1047_v24 = vsel %vm1043_vm0, %v5821_v6, %v5820_v35  ;;  %v5822_v37 = vld [vmem:[#allocation25_spill] sm:$0xff] }
 0x186   : > { %v1046_v44 = vsel %vm1043_vm0, %v5819_v42, %v5818_v43  ;;  %v1080_v57 = vsel %vm1076_vm1, %v1047_v24, %v4200_v63  ;;  %v5824_v43 = vld [vmem:[#allocation7_spill] sm:$0xff]  ;;  %v3329_v6 = vld [vmem:[%s3724_s19 + $0x7a] sm:$0xff] }
 0x187   : > { %v950_v38 = vpop.permute.xlu1 %949  ;;  %v948_v41 = vpop.permute.xlu0 %947  ;;  %v1079_v50 = vsel %vm1076_vm1, %v1046_v44, %v4202_v62  ;;  %v1113_v9 = vsel %vm1109_vm2, %v1080_v57, %v4337_v26 }
 0x188   : > { %v1177_v13 = vsel %vm1175_vm4, %v1144_v39, %v950_v38  ;;  %v1176_v25 = vsel %vm1175_vm4, %v1143_v7, %v948_v41  ;;  %v1112_v35 = vsel %vm1109_vm2, %v1079_v50, %v4339_v27  ;;  %v3298_v39 = vld [vmem:[%s3724_s19 + $0x81] sm:$0xff]  ;;  %v1146_v63 = vsel %vm1142_vm3, %v1113_v9, %v4475_v48 }
 0x189   : > { %2193 = vrot.lane.b32.xlu1 %v3297_v11, %s3678_s23  ;;  %2067 = vrot.lane.b32.xlu0 %v5822_v37, %s3677_s22  ;;  %v1145_v62 = vsel %vm1142_vm3, %v1112_v35, %v4477_v51  ;;  %v5823_v41 = vld [vmem:[#allocation6_spill] sm:$0xff]  ;;  %v1048_v27 = vsel %vm1043_vm0, %v4047_v1, %v5824_v43 }
 0x18a   : > { %3502 = vmatprep.mubr.msk.f32.mxu0 %vm1218_vm5, %v1176_v25  ;;  %v1049_v26 = vsel %vm1043_vm0, %v5790_v54, %v5823_v41  ;;  %v1081_v51 = vsel %vm1076_vm1, %v1048_v27, %v4212_v58  ;;  %v5826_v25 = vld [vmem:[#allocation9_spill] sm:$0xff]  ;;  %v3330_v9 = vld [vmem:[%s3724_s19 + $0x82] sm:$0xff]  ;;  %v4699_v41 = vld [vmem:[%s3724_s19 + $0x90] sm:$0xff] }
 0x18b   : > { %3503 = vmatmul.mubr.msk.f32.vlgmr.msra.gmra.mrb[0].mxu0 %vm1218_vm5, %v1177_v13  ;;  %v954_v7 = vpop.permute.xlu1 %953  ;;  %v952_v38 = vpop.permute.xlu0 %951  ;;  %v1082_v44 = vsel %vm1076_vm1, %v1049_v26, %v4210_v3  ;;  %v1114_v1 = vsel %vm1109_vm2, %v1081_v51, %v4349_v18  ;;  %v5825_v13 = vld [vmem:[#allocation8_spill] sm:$0xff]  ;;  %v1050_v18 = vsel %vm1043_vm0, %v5791_v55, %v5826_v25 }
 0x18c   : > { %v1179_v42 = vsel %vm1175_vm4, %v1146_v63, %v954_v7  ;;  %v1178_v48 = vsel %vm1175_vm4, %v1145_v62, %v952_v38  ;;  %v1115_v54 = vsel %vm1109_vm2, %v1082_v44, %v4347_v23  ;;  %v1147_v3 = vsel %vm1142_vm3, %v1114_v1, %v4485_v46  ;;  %v5827_v63 = vld [vmem:[#allocation12_spill] sm:$0xff]  ;;  %v5828_v62 = vld [vmem:[#allocation13_spill] sm:$0xff] }
 0x18d   : > { %2195 = vrot.lane.b32.xlu1 %v3298_v39, %s3678_s23  ;;  %1813 = vrot.lane.b32.xlu0 %v3297_v11, %s3675_s20  ;;  %v1148_v24 = vsel %vm1142_vm3, %v1115_v54, %v4483_v34  ;;  %v1051_v23 = vsel %vm1043_vm0, %v5792_v36, %v5825_v13  ;;  %v1083_v46 = vsel %vm1076_vm1, %v1050_v18, %v4218_v61  ;;  %v5830_v27 = vld [vmem:[#allocation16_spill] sm:$0xff]  ;;  %v4728_v54 = vld [vmem:[%s3724_s19 + $0x98] sm:$0xff] }
 0x18e   : > { %3505 = vmatprep.mubr.msk.f32.mxu0 %vm1218_vm5, %v1178_v48  ;;  %v1084_v50 = vsel %vm1076_vm1, %v1051_v23, %v4216_v32  ;;  %v1116_v55 = vsel %vm1109_vm2, %v1083_v46, %v4355_v29  ;;  %v1052_v29 = vsel %vm1043_vm0, %v5801_v8, %v5828_v62  ;;  %v3299_v51 = vld [vmem:[%s3724_s19 + $0x91] sm:$0xff]  ;;  %v5835_v46 = vld [vmem:[#allocation23_spill] sm:$0xff] }
 0x18f   : > { %3506 = vmatmul.mubr.msk.f32.gmra.mrb[2].mxu0 %vm1218_vm5, %v1179_v42  ;;  %v958_v58 = vpop.permute.xlu1 %957  ;;  %v956_v11 = vpop.permute.xlu0 %955  ;;  %v1117_v36 = vsel %vm1109_vm2, %v1084_v50, %v4353_v28  ;;  %v1149_v32 = vsel %vm1142_vm3, %v1116_v55, %v4491_v53  ;;  %v1053_v28 = vsel %vm1043_vm0, %v5804_v40, %v5827_v63  ;;  %v1085_v53 = vsel %vm1076_vm1, %v1052_v29, %v4226_v33  ;;  %v5837_v55 = vld [vmem:[#allocation24_spill] sm:$0xff] }
 0x190   : > { %v1181_v57 = vsel %vm1175_vm4, %v1148_v24, %v958_v58  ;;  %v1180_v34 = vsel %vm1175_vm4, %v1147_v3, %v956_v11  ;;  %v1150_v35 = vsel %vm1142_vm3, %v1117_v36, %v4489_v49  ;;  %v1086_v38 = vsel %vm1076_vm1, %v1053_v28, %v4224_v59  ;;  %v5832_v24 = vld [vmem:[#allocation29_spill] sm:$0xff]  ;;  %v5833_v3 = vld [vmem:[#allocation20_spill] sm:$0xff]  ;;  %v5834_v58 = vld [vmem:[#allocation30_spill] sm:$0xff] }
 0x191   : > { %1815 = vrot.lane.b32.xlu1 %v3298_v39, %s3675_s20  ;;  %2321 = vrot.lane.b32.xlu0 %v3329_v6, %s3679_s30  ;;  %v1119_v40 = vsel %vm1109_vm2, %v1086_v38, %v4361_v30  ;;  %v1118_v8 = vsel %vm1109_vm2, %v1085_v53, %v4363_v31  ;;  %v5829_v30 = vld [vmem:[#allocation15_spill] sm:$0xff]  ;;  %v1054_v42 = vsel %vm1043_vm0, %v5817_v10, %v5830_v27  ;;  %v5836_v36 = vld [vmem:[#allocation33_spill] sm:$0xff]  ;;  %v5839_v28 = vld [vmem:[#allocation14_spill] sm:$0xff] }
 0x192   : > { %3508 = vmatprep.mubr.msk.f32.mxu0 %vm1218_vm5, %v1180_v34  ;;  %v1152_v59 = vsel %vm1142_vm3, %v1119_v40, %v4496_v14  ;;  %v1151_v33 = vsel %vm1142_vm3, %v1118_v8, %v4498_v47  ;;  %v1055_v31 = vsel %vm1043_vm0, %v5822_v37, %v5829_v30  ;;  %v1087_v44 = vsel %vm1076_vm1, %v1054_v42, %v4234_v56  ;;  %v3331_v63 = vld [vmem:[%s3724_s19 + $0x92] sm:$0xff] }
 0x193   : > { %3509 = vmatmul.mubr.msk.f32.gmra.mrb[4].mxu0 %vm1218_vm5, %v1181_v57  ;;  %v962_v61 = vpop.permute.xlu1 %961  ;;  %v960_v39 = vpop.permute.xlu0 %959  ;;  %v1088_v47 = vsel %vm1076_vm1, %v1055_v31, %v4232_v60  ;;  %v1120_v10 = vsel %vm1109_vm2, %v1087_v44, %v4371_v21  ;;  %v1056_v11 = vsel %vm1043_vm0, %v5834_v58, %v5833_v3  ;;  %v3300_v57 = vld [vmem:[%s3724_s19 + $0x99] sm:$0xff]  ;;  %v5843_v53 = vld [vmem:[#allocation28_spill] sm:$0xff] }
 0x194   : > { %v1183_v7 = vsel %vm1175_vm4, %v1150_v35, %v962_v61  ;;  %v1182_v49 = vsel %vm1175_vm4, %v1149_v32, %v960_v39  ;;  %v1121_v37 = vsel %vm1109_vm2, %v1088_v47, %v4369_v20  ;;  %v1153_v56 = vsel %vm1142_vm3, %v1120_v10, %v4507_v15  ;;  %v5831_v20 = vld [vmem:[#allocation19_spill] sm:$0xff]  ;;  %v5842_v38 = vld [vmem:[#allocation37_spill] sm:$0xff]  ;;  %v5847_v31 = vld [vmem:[#allocation72_spill] sm:$0xff] }
 0x195   : > { %2323 = vrot.lane.b32.xlu1 %v3330_v9, %s3679_s30  ;;  %1941 = vrot.lane.b32.xlu0 %v3329_v6, %s3676_s21  ;;  %v1154_v60 = vsel %vm1142_vm3, %v1121_v37, %v4505_v52  ;;  %v1057_v21 = vsel %vm1043_vm0, %v5832_v24, %v5831_v20  ;;  %v1089_v15 = vsel %vm1076_vm1, %v1056_v11, %v4242_v2  ;;  %v5848_v42 = vld [vmem:[#allocation73_spill] sm:$0xff]  ;;  %v5850_v37 = vld [vmem:[#allocation88_spill] sm:$0xff]  ;;  %v5854_v24 = vld [vmem:[#allocation42_spill] sm:$0xff] }
 0x196   : > { %3511 = vmatprep.mubr.msk.f32.mxu0 %vm1218_vm5, %v1182_v49  ;;  %v1090_v23 = vsel %vm1076_vm1, %v1057_v21, %v4240_v0  ;;  %v1122_v18 = vsel %vm1109_vm2, %v1089_v15, %v4379_v19  ;;  %v5838_v19 = vld [vmem:[#allocation34_spill] sm:$0xff]  ;;  %v5841_v49 = vld [vmem:[#allocation27_spill] sm:$0xff]  ;;  %v5849_v47 = vld [vmem:[#allocation17_spill] sm:$0xff] }
 0x197   : > { %3512 = vmatmul.mubr.msk.f32.gmra.mrb[6].mxu0 %vm1218_vm5, %v1183_v7  ;;  %v966_v26 = vpop.permute.xlu1 %965  ;;  %v964_v43 = vpop.permute.xlu0 %963  ;;  %v1123_v25 = vsel %vm1109_vm2, %v1090_v23, %v4377_v22  ;;  %v1155_v2 = vsel %vm1142_vm3, %v1122_v18, %v4515_v45  ;;  %v1059_v22 = vsel %vm1043_vm0, %v5836_v36, %v5835_v46  ;;  %v5853_v20 = vld [vmem:[#allocation32_spill] sm:$0xff]  ;;  %v5855_v11 = vld [vmem:[#allocation58_spill] sm:$0xff]  ;;  %v5858_v18 = vld [vmem:[#allocation75_spill] sm:$0xff] }
 0x198   : > { %v1185_v48 = vsel %vm1175_vm4, %v1152_v59, %v966_v26  ;;  %v1184_v14 = vsel %vm1175_vm4, %v1151_v33, %v964_v43  ;;  %v1156_v0 = vsel %vm1142_vm3, %v1123_v25, %v4513_v12  ;;  %v1092_v32 = vsel %vm1076_vm1, %v1059_v22, %v4248_v4  ;;  %v5840_v4 = vld [vmem:[#allocation18_spill] sm:$0xff]  ;;  %v5845_v33 = vld [vmem:[#allocation56_spill] sm:$0xff]  ;;  %v5846_v43 = vld [vmem:[#allocation57_spill] sm:$0xff] }
 0x199   : > { %2069 = vrot.lane.b32.xlu1 %v4699_v41, %s3677_s22  ;;  %1943 = vrot.lane.b32.xlu0 %v3330_v9, %s3676_s21  ;;  %v1058_v9 = vsel %vm1043_vm0, %v5838_v19, %v5837_v55  ;;  %v1125_v61 = vsel %vm1109_vm2, %v1092_v32, %v4385_v16  ;;  %v1061_v16 = vsel %vm1043_vm0, %v5842_v38, %v5841_v49  ;;  %v5857_v15 = vld [vmem:[#allocation74_spill] sm:$0xff]  ;;  %v5861_v55 = vld [vmem:[#allocation35_spill] sm:$0xff]  ;;  %v5862_v19 = vld [vmem:[#allocation45_spill] sm:$0xff] }
 0x19a   : > { %3514 = vmatprep.mubr.msk.f32.mxu0 %vm1218_vm5, %v1184_v14  ;;  %v1091_v45 = vsel %vm1076_vm1, %v1058_v9, %v4250_v5  ;;  %v1158_v62 = vsel %vm1142_vm3, %v1125_v61, %v5839_v28  ;;  %v1094_v26 = vsel %vm1076_vm1, %v1061_v16, %v5845_v33  ;;  %v3332_v14 = vld [vmem:[%s3724_s19 + $0x9a] sm:$0xff]  ;;  %v1062_v21 = vsel %vm1043_vm0, %v5854_v24, %v5853_v20  ;;  %v3301_v49 = vld [vmem:[%s3724_s19 + $0xa9] sm:$0xff]  ;;  %v3334_v20 = vld [vmem:[%s3724_s19 + $0xb2] sm:$0xff] }
 0x19b   : > { %3515 = vmatmul.mubr.msk.f32.gmra.mrb[8].mxu0 %vm1218_vm5, %v1185_v48  ;;  %v970_v1 = vpop.permute.xlu1 %969  ;;  %v968_v6 = vpop.permute.xlu0 %967  ;;  %v1124_v39 = vsel %vm1109_vm2, %v1091_v45, %v4387_v17  ;;  %v5844_v17 = vld [vmem:[#allocation38_spill] sm:$0xff]  ;;  %v1127_v27 = vsel %vm1109_vm2, %v1094_v26, %v5847_v31  ;;  %v1065_v9 = vsel %vm1043_vm0, %v5862_v19, %v5861_v55  ;;  %v5866_v28 = vld [vmem:[#allocation61_spill] sm:$0xff]  ;;  %v4860_v38 = vld [vmem:[%s3724_s19 + $0xb0] sm:$0xff] }
 0x19c   : > { %v1187_v13 = vsel %vm1175_vm4, %v1154_v60, %v970_v1  ;;  %v1186_v52 = vsel %vm1175_vm4, %v1153_v56, %v968_v6  ;;  %v1157_v5 = vsel %vm1142_vm3, %v1124_v39, %v5840_v4  ;;  %v1060_v40 = vsel %vm1043_vm0, %v5844_v17, %v5843_v53  ;;  %v5851_v56 = vld [vmem:[#allocation31_spill] sm:$0xff]  ;;  %v5852_v1 = vld [vmem:[#allocation41_spill] sm:$0xff]  ;;  %v5865_v39 = vld [vmem:[#allocation60_spill] sm:$0xff] }
 0x19d   : > { %2197 = vrot.lane.b32.xlu1 %v3299_v51, %s3678_s23  ;;  %2071 = vrot.lane.b32.xlu0 %v4728_v54, %s3677_s22  ;;  %v1093_v30 = vsel %vm1076_vm1, %v1060_v40, %v5846_v43  ;;  %v1160_v44 = vsel %vm1142_vm3, %v1127_v27, %v5849_v47  ;;  %v1063_v6 = vsel %vm1043_vm0, %v5852_v1, %v5851_v56  ;;  %v5867_v4 = vld [vmem:[#allocation76_spill] sm:$0xff]  ;;  %v5869_v16 = vld [vmem:[#allocation91_spill] sm:$0xff]  ;;  %v5872_v26 = vld [vmem:[#allocation49_spill] sm:$0xff] }
 0x19e   : > { %3517 = vmatprep.mubr.msk.f32.mxu0 %vm1218_vm5, %v1186_v52  ;;  %v1126_v48 = vsel %vm1109_vm2, %v1093_v30, %v5848_v42  ;;  %v5856_v52 = vld [vmem:[#allocation59_spill] sm:$0xff]  ;;  %v5870_v17 = vld [vmem:[#allocation92_spill] sm:$0xff] }
 0x19f   : > { %3518 = vmatmul.mubr.msk.f32.gmra.mrb[10].mxu0 %vm1218_vm5, %v1187_v13  ;;  %v974_v34 = vpop.permute.xlu1 %973  ;;  %v972_v50 = vpop.permute.xlu0 %971  ;;  %v1159_v10 = vsel %vm1142_vm3, %v1126_v48, %v5850_v37  ;;  %v1096_v13 = vsel %vm1076_vm1, %v1063_v6, %v5855_v11  ;;  %v1095_v23 = vsel %vm1076_vm1, %v1062_v21, %v5856_v52  ;;  %v5871_v33 = vld [vmem:[#allocation40_spill] sm:$0xff]  ;;  %v5873_v27 = vld [vmem:[#allocation63_spill] sm:$0xff] }
 0x1a0   : > { %v1189_v35 = vsel %vm1175_vm4, %v1156_v0, %v974_v34  ;;  %v1188_v12 = vsel %vm1175_vm4, %v1155_v2, %v972_v50  ;;  %v1129_v25 = vsel %vm1109_vm2, %v1096_v13, %v5857_v15  ;;  %v4831_v0 = vld [vmem:[%s3724_s19 + $0xa8] sm:$0xff]  ;;  %v5859_v2 = vld [vmem:[#allocation89_spill] sm:$0xff]  ;;  %v5860_v50 = vld [vmem:[#allocation90_spill] sm:$0xff]  ;;  %v1066_v43 = vsel %vm1043_vm0, %v5872_v26, %v5871_v33 }
 0x1a1   : > { %2199 = vrot.lane.b32.xlu1 %v3300_v57, %s3678_s23  ;;  %1817 = vrot.lane.b32.xlu0 %v3299_v51, %s3675_s20  ;;  %v1162_v34 = vsel %vm1142_vm3, %v1129_v25, %v5859_v2  ;;  %v1099_v42 = vsel %vm1076_vm1, %v1066_v43, %v5873_v27  ;;  %v5874_v48 = vld [vmem:[#allocation79_spill] sm:$0xff]  ;;  %v3302_v47 = vld [vmem:[%s3724_s19 + $0xb1] sm:$0xff]  ;;  %v3164_v2 = vld [vmem:[%s3724_s19 + $0x20] sm:$0xff] }
 0x1a2   : > { %3520 = vmatprep.mubr.msk.f32.mxu0 %vm1218_vm5, %v1188_v12  ;;  %v5864_v12 = vld [vmem:[#allocation46_spill] sm:$0xff]  ;;  %v3333_v56 = vld [vmem:[%s3724_s19 + $0xaa] sm:$0xff]  ;;  %v3163_v13 = vld [vmem:[%s3724_s19 + $0x18] sm:$0xff] }
 0x1a3   : > { %3521 = vmatmul.mubr.msk.f32.gmra.mrb[12].mxu0 %vm1218_vm5, %v1189_v35  ;;  %v978_v29 = vpop.permute.xlu1 %977  ;;  %v976_v7 = vpop.permute.xlu0 %975  ;;  %v5863_v35 = vld [vmem:[#allocation36_spill] sm:$0xff]  ;;  %v3303_v52 = vld [vmem:[%s3724_s19 + $0xc1] sm:$0xff] }
 0x1a4   : > { %v1191_v8 = vsel %vm1175_vm4, %v1158_v62, %v978_v29  ;;  %v1190_v59 = vsel %vm1175_vm4, %v1157_v5, %v976_v7  ;;  %v1064_v32 = vsel %vm1043_vm0, %v5864_v12, %v5863_v35  ;;  %v5868_v29 = vld [vmem:[#allocation77_spill] sm:$0xff]  ;;  %v3335_v12 = vld [vmem:[%s3724_s19 + $0xc2] sm:$0xff] }
 0x1a5   : > { %1819 = vrot.lane.b32.xlu1 %v3300_v57, %s3675_s20  ;;  %2325 = vrot.lane.b32.xlu0 %v3331_v63, %s3679_s30  ;;  %v1128_v57 = vsel %vm1109_vm2, %v1095_v23, %v5858_v18  ;;  %v1097_v62 = vsel %vm1076_vm1, %v1064_v32, %v5866_v28  ;;  %v4903_v23 = vld [vmem:[%s3724_s19 + $0xc8] sm:$0xff] }
 0x1a6   : > { %3523 = vmatprep.mubr.msk.f32.mxu0 %vm1218_vm5, %v1190_v59  ;;  %v1161_v46 = vsel %vm1142_vm3, %v1128_v57, %v5860_v50  ;;  %v1130_v7 = vsel %vm1109_vm2, %v1097_v62, %v5868_v29  ;;  %v3304_v50 = vld [vmem:[%s3724_s19 + $0xc9] sm:$0xff]  ;;  %v3306_v26 = vld [vmem:[%s3724_s19 + $0xe1] sm:$0xff] }
 0x1a7   : > { %3524 = vmatmul.mubr.msk.f32.gmra.mrb[14].mxu0 %vm1218_vm5, %v1191_v8  ;;  %v982_v51 = vpop.permute.xlu1 %981  ;;  %v980_v60 = vpop.permute.xlu0 %979  ;;  %v1163_v40 = vsel %vm1142_vm3, %v1130_v7, %v5870_v17  ;;  %v3165_v7 = vld [vmem:[%s3724_s19 + $0x30] sm:$0xff] }
 0x1a8   : > { %v1193_v3 = vsel %vm1175_vm4, %v1160_v44, %v982_v51  ;;  %v1192_v58 = vsel %vm1175_vm4, %v1159_v10, %v980_v60  ;;  %v5875_v44 = vld [vmem:[#allocation93_spill] sm:$0xff] }
 0x1a9   : > { %2327 = vrot.lane.b32.xlu1 %v3332_v14, %s3679_s30  ;;  %1945 = vrot.lane.b32.xlu0 %v3331_v63, %s3676_s21  ;;  %v1098_v63 = vsel %vm1076_vm1, %v1065_v9, %v5865_v39 }
 0x1aa   : > { %3526 = vmatprep.mubr.msk.f32.mxu0 %vm1218_vm5, %v1192_v58  ;;  %v1131_v5 = vsel %vm1109_vm2, %v1098_v63, %v5867_v4  ;;  %v3336_v63 = vld [vmem:[%s3724_s19 + $0xca] sm:$0xff]  ;;  %v4931_v4 = vld [vmem:[%s3724_s19 + $0xd8] sm:$0xff] }
 0x1ab   : > { %3527 = vmatmul.mubr.msk.f32.gmra.mrb[16].mxu0 %vm1218_vm5, %v1193_v3  ;;  %v986_v36 = vpop.permute.xlu1 %985  ;;  %v984_v22 = vpop.permute.xlu0 %983  ;;  %v1164_v53 = vsel %vm1142_vm3, %v1131_v5, %v5869_v16  ;;  %v4895_v3 = vld [vmem:[%s3724_s19 + $0xc0] sm:$0xff] }
 0x1ac   : > { %v1195_v45 = vsel %vm1175_vm4, %v1162_v34, %v986_v36  ;;  %v1194_v61 = vsel %vm1175_vm4, %v1161_v46, %v984_v22  ;;  %v4939_v16 = vld [vmem:[%s3724_s19 + $0xe0] sm:$0xff] }
 0x1ad   : > { %2073 = vrot.lane.b32.xlu1 %v4831_v0, %s3677_s22  ;;  %1947 = vrot.lane.b32.xlu0 %v3332_v14, %s3676_s21  ;;  %v1132_v14 = vsel %vm1109_vm2, %v1099_v42, %v5874_v48 }
 0x1ae   : > { %3529 = vmatprep.mubr.msk.f32.mxu0 %vm1218_vm5, %v1194_v61  ;;  %v1165_v37 = vsel %vm1142_vm3, %v1132_v14, %v5875_v44 }
 0x1af   : > { %3530 = vmatmul.mubr.msk.f32.gmra.mrb[18].mxu0 %vm1218_vm5, %v1195_v45  ;;  %v990_v8 = vpop.permute.xlu1 %989  ;;  %v988_v59 = vpop.permute.xlu0 %987 }
 0x1b0   : > { %v1197_v30 = vsel %vm1175_vm4, %v1164_v53, %v990_v8  ;;  %v1196_v31 = vsel %vm1175_vm4, %v1163_v40, %v988_v59  ;;  %v3166_v8 = vld [vmem:[%s3724_s19 + $0x38] sm:$0xff] }
 0x1b1   : > { %2201 = vrot.lane.b32.xlu1 %v3301_v49, %s3678_s23  ;;  %2075 = vrot.lane.b32.xlu0 %v4860_v38, %s3677_s22 }
 0x1b2   : > { %3532 = vmatprep.mubr.msk.f32.mxu0 %vm1218_vm5, %v1196_v31 }
 0x1b3   : > { %3533 = vmatmul.mubr.msk.f32.gmra.mrb[20].mxu0 %vm1218_vm5, %v1197_v30  ;;  %v1798_v10 = vpop.permute.xlu1 %1797  ;;  %v992_v51 = vpop.permute.xlu0 %991 }
 0x1b4   : > { %v1198_v60 = vsel %vm1175_vm4, %v1165_v37, %v992_v51  ;;  %v2405_v18 = vsel %vm1043_vm0, %v3163_v13, %v1798_v10 }
 0x1b5   : > { %2203 = vrot.lane.b32.xlu1 %v3302_v47, %s3678_s23  ;;  %1821 = vrot.lane.b32.xlu0 %v3301_v49, %s3675_s20  ;;  %v3305_v49 = vld [vmem:[%s3724_s19 + $0xd9] sm:$0xff] }
 0x1b6   : > { %3535 = vmatprep.mubr.msk.f32.mxu0 %vm1218_vm5, %v1198_v60  ;;  %v3338_v60 = vld [vmem:[%s3724_s19 + $0xe2] sm:$0xff] }
 0x1b7   : > { %v1926_v1 = vpop.permute.xlu1 %1925  ;;  %v1800_v6 = vpop.permute.xlu0 %1799 }
 0x1b8   : > { %v2437_v57 = vsel %vm1076_vm1, %v2405_v18, %v1926_v1  ;;  %v2406_v55 = vsel %vm1043_vm0, %v3164_v2, %v1800_v6  ;;  %v4967_v6 = vld [vmem:[%s3724_s19 + $0xf0] sm:$0xff]  ;;  %v3308_v2 = vld [vmem:[%s3724_s19 + $0xf9] sm:$0xff] }
 0x1b9   : > { %1823 = vrot.lane.b32.xlu1 %v3302_v47, %s3675_s20  ;;  %2329 = vrot.lane.b32.xlu0 %v3333_v56, %s3679_s30  ;;  %v3337_v47 = vld [vmem:[%s3724_s19 + $0xda] sm:$0xff] }
 0x1bb   : > { %v2054_v24 = vpop.permute.xlu1 %2053  ;;  %v1928_v21 = vpop.permute.xlu0 %1927 }
 0x1bc   : > { %v2469_v34 = vsel %vm1109_vm2, %v2437_v57, %v2054_v24  ;;  %v2438_v9 = vsel %vm1076_vm1, %v2406_v55, %v1928_v21  ;;  %v3167_v21 = vld [vmem:[%s3724_s19 + $0x48] sm:$0xff] }
 0x1bd   : > { %2331 = vrot.lane.b32.xlu1 %v3334_v20, %s3679_s30  ;;  %1949 = vrot.lane.b32.xlu0 %v3333_v56, %s3676_s21 }
 0x1bf   : > { %v2182_v58 = vpop.permute.xlu1 %2181  ;;  %v2056_v11 = vpop.permute.xlu0 %2055 }
 0x1c0   : > { %v2501_v46 = vsel %vm1142_vm3, %v2469_v34, %v2182_v58  ;;  %v2470_v35 = vsel %vm1109_vm2, %v2438_v9, %v2056_v11  ;;  %v3307_v58 = vld [vmem:[%s3724_s19 + $0xf1] sm:$0xff] }
 0x1c1   : > { %2077 = vrot.lane.b32.xlu1 %v4895_v3, %s3677_s22  ;;  %1951 = vrot.lane.b32.xlu0 %v3334_v20, %s3676_s21  ;;  %v4975_v11 = vld [vmem:[%s3724_s19 + $0xf8] sm:$0xff] }
 0x1c2   : > { %v3339_v9 = vld [vmem:[%s3724_s19 + $0xf2] sm:$0xff] }
 0x1c3   : > { %v2184_v15 = vpop.permute.xlu1 %2183  ;;  %v1802_v25 = vpop.permute.xlu0 %1801 }
 0x1c4   : > { %v2502_v32 = vsel %vm1142_vm3, %v2470_v35, %v2184_v15  ;;  %v2407_v40 = vsel %vm1043_vm0, %v3165_v7, %v1802_v25  ;;  %v3168_v25 = vld [vmem:[%s3724_s19 + $0x50] sm:$0xff] }
 0x1c5   : > { %2205 = vrot.lane.b32.xlu1 %v3303_v52, %s3678_s23  ;;  %2079 = vrot.lane.b32.xlu0 %v4903_v23, %s3677_s22  ;;  %v3309_v7 = vld [vmem:[%s3724_s19 + $0x109] sm:$0xff] }
 0x1c7   : > { %v1804_v36 = vpop.permute.xlu1 %1803  ;;  %v2310_v22 = vpop.permute.xlu0 %2309 }
 0x1c8   : > { %v2533_v19 = vsel %vm1175_vm4, %v2501_v46, %v2310_v22  ;;  %v2408_v27 = vsel %vm1043_vm0, %v3166_v8, %v1804_v36  ;;  %v3170_v8 = vld [vmem:[%s3724_s19 + $0x68] sm:$0xff] }
 0x1c9   : > { %2207 = vrot.lane.b32.xlu1 %v3304_v50, %s3678_s23  ;;  %1825 = vrot.lane.b32.xlu0 %v3303_v52, %s3675_s20 }
 0x1ca   : > { %3556 = vmatprep.mubr.msk.f32.mxu1 %vm1218_vm5, %v2533_v19 }
 0x1cb   : > { %v2312_v45 = vpop.permute.xlu1 %2311  ;;  %v1930_v61 = vpop.permute.xlu0 %1929 }
 0x1cc   : > { %v2534_v39 = vsel %vm1175_vm4, %v2502_v32, %v2312_v45  ;;  %v2439_v59 = vsel %vm1076_vm1, %v2407_v40, %v1930_v61  ;;  %v3340_v61 = vld [vmem:[%s3724_s19 + $0xfa] sm:$0xff] }
 0x1cd   : > { %1827 = vrot.lane.b32.xlu1 %v3304_v50, %s3675_s20  ;;  %2333 = vrot.lane.b32.xlu0 %v3335_v12, %s3679_s30 }
 0x1ce   : > { %3557 = vmatmul.mubr.msk.f32.vlgmr.msra.gmra.mrb[0].mxu1 %vm1218_vm5, %v2534_v39 }
 0x1cf   : > { %v2058_v28 = vpop.permute.xlu1 %2057  ;;  %v1932_v62 = vpop.permute.xlu0 %1931 }
 0x1d0   : > { %v2471_v33 = vsel %vm1109_vm2, %v2439_v59, %v2058_v28  ;;  %v2440_v48 = vsel %vm1076_vm1, %v2408_v27, %v1932_v62  ;;  %v5003_v28 = vld [vmem:[%s3724_s19 + $0x108] sm:$0xff] }
 0x1d1   : > { %2335 = vrot.lane.b32.xlu1 %v3336_v63, %s3679_s30  ;;  %1953 = vrot.lane.b32.xlu0 %v3335_v12, %s3676_s21 }
 0x1d3   : > { %v2186_v5 = vpop.permute.xlu1 %2185  ;;  %v2060_v29 = vpop.permute.xlu0 %2059 }
 0x1d4   : > { %v2503_v43 = vsel %vm1142_vm3, %v2471_v33, %v2186_v5  ;;  %v2472_v14 = vsel %vm1109_vm2, %v2440_v48, %v2060_v29  ;;  %v3169_v29 = vld [vmem:[%s3724_s19 + $0x60] sm:$0xff] }
 0x1d5   : > { %2081 = vrot.lane.b32.xlu1 %v4931_v4, %s3677_s22  ;;  %1955 = vrot.lane.b32.xlu0 %v3336_v63, %s3676_s21 }
 0x1d7   : > { %v2188_v53 = vpop.permute.xlu1 %2187  ;;  %v1806_v17 = vpop.permute.xlu0 %1805 }
 0x1d8   : > { %v2504_v44 = vsel %vm1142_vm3, %v2472_v14, %v2188_v53  ;;  %v2409_v15 = vsel %vm1043_vm0, %v3167_v21, %v1806_v17 }
 0x1d9   : > { %2209 = vrot.lane.b32.xlu1 %v3305_v49, %s3678_s23  ;;  %2083 = vrot.lane.b32.xlu0 %v4939_v16, %s3677_s22 }
 0x1db   : > { %v1808_v30 = vpop.permute.xlu1 %1807  ;;  %v2314_v31 = vpop.permute.xlu0 %2313 }
 0x1dc   : > { %v2535_v42 = vsel %vm1175_vm4, %v2503_v43, %v2314_v31  ;;  %v2410_v36 = vsel %vm1043_vm0, %v3168_v25, %v1808_v30 }
 0x1dd   : > { %2211 = vrot.lane.b32.xlu1 %v3306_v26, %s3678_s23  ;;  %1829 = vrot.lane.b32.xlu0 %v3305_v49, %s3675_s20  ;;  %v5011_v49 = vld [vmem:[%s3724_s19 + $0x110] sm:$0xff] }
 0x1de   : > { %3559 = vmatprep.mubr.msk.f32.mxu1 %vm1218_vm5, %v2535_v42 }
 0x1df   : > { %v2316_v37 = vpop.permute.xlu1 %2315  ;;  %v1934_v10 = vpop.permute.xlu0 %1933 }
 0x1e0   : > { %v2536_v51 = vsel %vm1175_vm4, %v2504_v44, %v2316_v37  ;;  %v2441_v18 = vsel %vm1076_vm1, %v2409_v15, %v1934_v10 }
 0x1e1   : > { %1831 = vrot.lane.b32.xlu1 %v3306_v26, %s3675_s20  ;;  %2337 = vrot.lane.b32.xlu0 %v3337_v47, %s3679_s30  ;;  %v3310_v26 = vld [vmem:[%s3724_s19 + $0x111] sm:$0xff] }
 0x1e2   : > { %3560 = vmatmul.mubr.msk.f32.gmra.mrb[2].mxu1 %vm1218_vm5, %v2536_v51 }
 0x1e3   : > { %v2062_v56 = vpop.permute.xlu1 %2061  ;;  %v1936_v1 = vpop.permute.xlu0 %1935 }
 0x1e4   : > { %v2473_v57 = vsel %vm1109_vm2, %v2441_v18, %v2062_v56  ;;  %v2442_v55 = vsel %vm1076_vm1, %v2410_v36, %v1936_v1 }
 0x1e5   : > { %2339 = vrot.lane.b32.xlu1 %v3338_v60, %s3679_s30  ;;  %1957 = vrot.lane.b32.xlu0 %v3337_v47, %s3676_s21  ;;  %v3341_v47 = vld [vmem:[%s3724_s19 + $0x10a] sm:$0xff] }
 0x1e7   : > { %v2190_v20 = vpop.permute.xlu1 %2189  ;;  %v2064_v24 = vpop.permute.xlu0 %2063 }
 0x1e8   : > { %v2505_v34 = vsel %vm1142_vm3, %v2473_v57, %v2190_v20  ;;  %v2474_v19 = vsel %vm1109_vm2, %v2442_v55, %v2064_v24  ;;  %v5039_v20 = vld [vmem:[%s3724_s19 + $0x120] sm:$0xff] }
 0x1e9   : > { %2085 = vrot.lane.b32.xlu1 %v4967_v6, %s3677_s22  ;;  %1959 = vrot.lane.b32.xlu0 %v3338_v60, %s3676_s21  ;;  %v3342_v60 = vld [vmem:[%s3724_s19 + $0x112] sm:$0xff]  ;;  %v3172_v57 = vld [vmem:[%s3724_s19 + $0x80] sm:$0xff] }
 0x1eb   : > { %v2192_v13 = vpop.permute.xlu1 %2191  ;;  %v1810_v52 = vpop.permute.xlu0 %1809 }
 0x1ec   : > { %v2506_v35 = vsel %vm1142_vm3, %v2474_v19, %v2192_v13  ;;  %v2411_v40 = vsel %vm1043_vm0, %v3169_v29, %v1810_v52  ;;  %v3311_v13 = vld [vmem:[%s3724_s19 + $0x121] sm:$0xff]  ;;  %v5075_v29 = vld [vmem:[%s3724_s19 + $0x138] sm:$0xff] }
 0x1ed   : > { %2213 = vrot.lane.b32.xlu1 %v3307_v58, %s3678_s23  ;;  %2087 = vrot.lane.b32.xlu0 %v4975_v11, %s3677_s22  ;;  %v5047_v52 = vld [vmem:[%s3724_s19 + $0x128] sm:$0xff] }
 0x1ef   : > { %v1812_v50 = vpop.permute.xlu1 %1811  ;;  %v2318_v46 = vpop.permute.xlu0 %2317 }
 0x1f0   : > { %v2537_v22 = vsel %vm1175_vm4, %v2505_v34, %v2318_v46  ;;  %v2412_v27 = vsel %vm1043_vm0, %v3170_v8, %v1812_v50  ;;  %v3312_v50 = vld [vmem:[%s3724_s19 + $0x129] sm:$0xff] }
 0x1f1   : > { %2215 = vrot.lane.b32.xlu1 %v3308_v2, %s3678_s23  ;;  %1833 = vrot.lane.b32.xlu0 %v3307_v58, %s3675_s20  ;;  %v3171_v58 = vld [vmem:[%s3724_s19 + $0x78] sm:$0xff] }
 0x1f2   : > { %3562 = vmatprep.mubr.msk.f32.mxu1 %vm1218_vm5, %v2537_v22 }
 0x1f3   : > { %v2320_v12 = vpop.permute.xlu1 %2319  ;;  %v1938_v32 = vpop.permute.xlu0 %1937 }
 0x1f4   : > { %v2538_v45 = vsel %vm1175_vm4, %v2506_v35, %v2320_v12  ;;  %v2443_v59 = vsel %vm1076_vm1, %v2411_v40, %v1938_v32  ;;  %v3343_v12 = vld [vmem:[%s3724_s19 + $0x122] sm:$0xff] }
 0x1f5   : > { %1835 = vrot.lane.b32.xlu1 %v3308_v2, %s3675_s20  ;;  %2341 = vrot.lane.b32.xlu0 %v3339_v9, %s3679_s30  ;;  %v5082_v40 = vld [vmem:[%s3724_s19 + $0x140] sm:$0xff] }
 0x1f6   : > { %3563 = vmatmul.mubr.msk.f32.gmra.mrb[4].mxu1 %vm1218_vm5, %v2538_v45 }
 0x1f7   : > { %v2066_v39 = vpop.permute.xlu1 %2065  ;;  %v1940_v63 = vpop.permute.xlu0 %1939 }
 0x1f8   : > { %v2475_v33 = vsel %vm1109_vm2, %v2443_v59, %v2066_v39  ;;  %v2444_v48 = vsel %vm1076_vm1, %v2412_v27, %v1940_v63  ;;  %v3344_v63 = vld [vmem:[%s3724_s19 + $0x12a] sm:$0xff] }
 0x1f9   : > { %2343 = vrot.lane.b32.xlu1 %v3340_v61, %s3679_s30  ;;  %1961 = vrot.lane.b32.xlu0 %v3339_v9, %s3676_s21 }
 0x1fb   : > { %v2194_v62 = vpop.permute.xlu1 %2193  ;;  %v2068_v5 = vpop.permute.xlu0 %2067 }
 0x1fc   : > { %v2507_v43 = vsel %vm1142_vm3, %v2475_v33, %v2194_v62  ;;  %v2476_v14 = vsel %vm1109_vm2, %v2444_v48, %v2068_v5 }
 0x1fd   : > { %2089 = vrot.lane.b32.xlu1 %v5003_v28, %s3677_s22  ;;  %1963 = vrot.lane.b32.xlu0 %v3340_v61, %s3676_s21 }
 0x1ff   : > { %v2196_v53 = vpop.permute.xlu1 %2195  ;;  %v1814_v17 = vpop.permute.xlu0 %1813 }
 0x200   : > { %v2508_v44 = vsel %vm1142_vm3, %v2476_v14, %v2196_v53  ;;  %v2413_v18 = vsel %vm1043_vm0, %v3171_v58, %v1814_v17  ;;  %v3313_v17 = vld [vmem:[%s3724_s19 + $0x139] sm:$0xff] }
 0x201   : > { %2217 = vrot.lane.b32.xlu1 %v3309_v7, %s3678_s23  ;;  %2091 = vrot.lane.b32.xlu0 %v5011_v49, %s3677_s22  ;;  %v5113_v58 = vld [vmem:[%s3724_s19 + $0x158] sm:$0xff] }
 0x203   : > { %v1816_v30 = vpop.permute.xlu1 %1815  ;;  %v2322_v31 = vpop.permute.xlu0 %2321 }
 0x204   : > { %v2539_v42 = vsel %vm1175_vm4, %v2507_v43, %v2322_v31  ;;  %v2414_v55 = vsel %vm1043_vm0, %v3172_v57, %v1816_v30  ;;  %v3314_v30 = vld [vmem:[%s3724_s19 + $0x141] sm:$0xff] }
 0x205   : > { %2219 = vrot.lane.b32.xlu1 %v3310_v26, %s3678_s23  ;;  %1837 = vrot.lane.b32.xlu0 %v3309_v7, %s3675_s20 }
 0x206   : > { %3565 = vmatprep.mubr.msk.f32.mxu1 %vm1218_vm5, %v2539_v42 }
 0x207   : > { %v2324_v37 = vpop.permute.xlu1 %2323  ;;  %v1942_v10 = vpop.permute.xlu0 %1941 }
 0x208   : > { %v2540_v51 = vsel %vm1175_vm4, %v2508_v44, %v2324_v37  ;;  %v2445_v2 = vsel %vm1076_vm1, %v2413_v18, %v1942_v10  ;;  %v3345_v44 = vld [vmem:[%s3724_s19 + $0x13a] sm:$0xff] }
 0x209   : > { %1839 = vrot.lane.b32.xlu1 %v3310_v26, %s3675_s20  ;;  %2345 = vrot.lane.b32.xlu0 %v3341_v47, %s3679_s30 }
 0x20a   : > { %3566 = vmatmul.mubr.msk.f32.gmra.mrb[6].mxu1 %vm1218_vm5, %v2540_v51 }
 0x20b   : > { %v2070_v56 = vpop.permute.xlu1 %2069  ;;  %v1944_v1 = vpop.permute.xlu0 %1943 }
 0x20c   : > { %v2477_v34 = vsel %vm1109_vm2, %v2445_v2, %v2070_v56  ;;  %v2446_v9 = vsel %vm1076_vm1, %v2414_v55, %v1944_v1  ;;  %v3252_v1 = vld [vmem:[%s3724_s19 + $0x142] sm:$0xff] }
 0x20d   : > { %2347 = vrot.lane.b32.xlu1 %v3342_v60, %s3679_s30  ;;  %1965 = vrot.lane.b32.xlu0 %v3341_v47, %s3676_s21 }
 0x20f   : > { %v2198_v24 = vpop.permute.xlu1 %2197  ;;  %v2072_v21 = vpop.permute.xlu0 %2071 }
 0x210   : > { %v2509_v46 = vsel %vm1142_vm3, %v2477_v34, %v2198_v24  ;;  %v2478_v35 = vsel %vm1109_vm2, %v2446_v9, %v2072_v21  ;;  %v3315_v34 = vld [vmem:[%s3724_s19 + $0x151] sm:$0xff]  ;;  %v3316_v9 = vld [vmem:[%s3724_s19 + $0x159] sm:$0xff] }
 0x211   : > { %2093 = vrot.lane.b32.xlu1 %v5039_v20, %s3677_s22  ;;  %1967 = vrot.lane.b32.xlu0 %v3342_v60, %s3676_s21 }
 0x213   : > { %v2200_v15 = vpop.permute.xlu1 %2199  ;;  %v1818_v25 = vpop.permute.xlu0 %1817 }
 0x214   : > { %v2510_v32 = vsel %vm1142_vm3, %v2478_v35, %v2200_v15  ;;  %v2415_v33 = vsel %vm1043_vm0, %v4699_v41, %v1818_v25 }
 0x215   : > { %2221 = vrot.lane.b32.xlu1 %v3311_v13, %s3678_s23  ;;  %2095 = vrot.lane.b32.xlu0 %v5047_v52, %s3677_s22 }
 0x217   : > { %v1820_v36 = vpop.permute.xlu1 %1819  ;;  %v2326_v22 = vpop.permute.xlu0 %2325 }
 0x218   : > { %v2541_v19 = vsel %vm1175_vm4, %v2509_v46, %v2326_v22  ;;  %v2416_v48 = vsel %vm1043_vm0, %v4728_v54, %v1820_v36 }
 0x219   : > { %2223 = vrot.lane.b32.xlu1 %v3312_v50, %s3678_s23  ;;  %1841 = vrot.lane.b32.xlu0 %v3311_v13, %s3675_s20  ;;  %v5116_v13 = vld [vmem:[%s3724_s19 + $0x150] sm:$0xff] }
 0x21a   : > { %3568 = vmatprep.mubr.msk.f32.mxu1 %vm1218_vm5, %v2541_v19 }
 0x21b   : > { %v2328_v45 = vpop.permute.xlu1 %2327  ;;  %v1946_v61 = vpop.permute.xlu0 %1945 }
 0x21c   : > { %v2542_v39 = vsel %vm1175_vm4, %v2510_v32, %v2328_v45  ;;  %v2447_v26 = vsel %vm1076_vm1, %v2415_v33, %v1946_v61  ;;  %v3347_v45 = vld [vmem:[%s3724_s19 + $0x152] sm:$0xff] }
 0x21d   : > { %1843 = vrot.lane.b32.xlu1 %v3312_v50, %s3675_s20  ;;  %2349 = vrot.lane.b32.xlu0 %v3343_v12, %s3679_s30  ;;  %v5155_v33 = vld [vmem:[%s3724_s19 + $0x170] sm:$0xff] }
 0x21e   : > { %3569 = vmatmul.mubr.msk.f32.gmra.mrb[8].mxu1 %vm1218_vm5, %v2542_v39 }
 0x21f   : > { %v2074_v62 = vpop.permute.xlu1 %2073  ;;  %v1948_v5 = vpop.permute.xlu0 %1947 }
 0x220   : > { %v2479_v43 = vsel %vm1109_vm2, %v2447_v26, %v2074_v62  ;;  %v2448_v14 = vsel %vm1076_vm1, %v2416_v48, %v1948_v5  ;;  %v3254_v5 = vld [vmem:[%s3724_s19 + $0x15a] sm:$0xff]  ;;  %v5158_v26 = vld [vmem:[%s3724_s19 + $0x168] sm:$0xff] }
 0x221   : > { %2351 = vrot.lane.b32.xlu1 %v3344_v63, %s3679_s30  ;;  %1969 = vrot.lane.b32.xlu0 %v3343_v12, %s3676_s21 }
 0x223   : > { %v2202_v7 = vpop.permute.xlu1 %2201  ;;  %v2076_v53 = vpop.permute.xlu0 %2075 }
 0x224   : > { %v2511_v31 = vsel %vm1142_vm3, %v2479_v43, %v2202_v7  ;;  %v2480_v47 = vsel %vm1109_vm2, %v2448_v14, %v2076_v53 }
 0x225   : > { %2097 = vrot.lane.b32.xlu1 %v5075_v29, %s3677_s22  ;;  %1971 = vrot.lane.b32.xlu0 %v3344_v63, %s3676_s21 }
 0x227   : > { %v2204_v8 = vpop.permute.xlu1 %2203  ;;  %v1822_v59 = vpop.permute.xlu0 %1821 }
 0x228   : > { %v2512_v37 = vsel %vm1142_vm3, %v2480_v47, %v2204_v8  ;;  %v2417_v18 = vsel %vm1043_vm0, %v4831_v0, %v1822_v59 }
 0x229   : > { %2225 = vrot.lane.b32.xlu1 %v3313_v17, %s3678_s23  ;;  %2099 = vrot.lane.b32.xlu0 %v5082_v40, %s3677_s22 }
 0x22b   : > { %v1824_v27 = vpop.permute.xlu1 %1823  ;;  %v2330_v42 = vpop.permute.xlu0 %2329 }
 0x22c   : > { %v2543_v41 = vsel %vm1175_vm4, %v2511_v31, %v2330_v42  ;;  %v2418_v0 = vsel %vm1043_vm0, %v4860_v38, %v1824_v27 }
 0x22d   : > { %2227 = vrot.lane.b32.xlu1 %v3314_v30, %s3678_s23  ;;  %1845 = vrot.lane.b32.xlu0 %v3313_v17, %s3675_s20 }
 0x22e   : > { %3571 = vmatprep.mubr.msk.f32.mxu1 %vm1218_vm5, %v2543_v41  ;;  %v3317_v41 = vld [vmem:[%s3724_s19 + $0x169] sm:$0xff] }
 0x22f   : > { %v2332_v10 = vpop.permute.xlu1 %2331  ;;  %v1950_v54 = vpop.permute.xlu0 %1949 }
 0x230   : > { %v2544_v51 = vsel %vm1175_vm4, %v2512_v37, %v2332_v10  ;;  %v2449_v57 = vsel %vm1076_vm1, %v2417_v18, %v1950_v54  ;;  %v3318_v37 = vld [vmem:[%s3724_s19 + $0x171] sm:$0xff] }
 0x231   : > { %993 = vrot.lane.b32.xlu1 %v3344_v63, %s3679_s30  ;;  %2353 = vrot.lane.b32.xlu0 %v3345_v44, %s3679_s30 }
 0x232   : > { %3572 = vmatmul.mubr.msk.f32.gmra.mrb[10].mxu1 %vm1218_vm5, %v2544_v51  ;;  %v5182_v51 = vld [vmem:[%s5675_s2] ss:$0 sm:$0xff] }
 0x233   : > { %v2078_v60 = vpop.permute.xlu1 %2077  ;;  %v1952_v56 = vpop.permute.xlu0 %1951 }
 0x234   : > { %v2481_v2 = vsel %vm1109_vm2, %v2449_v57, %v2078_v60  ;;  %v2450_v55 = vsel %vm1076_vm1, %v2418_v0, %v1952_v56  ;;  %v5192_v56 = vld [vmem:[%s3724_s19 + $0x16a] sm:$0xff] }
 0x235   : > { %1973 = vrot.lane.b32.xlu1 %v3345_v44, %s3676_s21  ;;  %1847 = vrot.lane.b32.xlu0 %v3314_v30, %s3675_s20 }
 0x237   : > { %v2206_v24 = vpop.permute.xlu1 %2205  ;;  %v2080_v21 = vpop.permute.xlu0 %2079 }
 0x238   : > { %v2513_v50 = vsel %vm1142_vm3, %v2481_v2, %v2206_v24  ;;  %v2482_v19 = vsel %vm1109_vm2, %v2450_v55, %v2080_v21  ;;  %v5218_v55 = vld [vmem:[%s3724_s19 + $0x172] sm:$0xff] }
 0x239   : > { %1975 = vrot.lane.b32.xlu1 %v3252_v1, %s3676_s21  ;;  %2355 = vrot.lane.b32.xlu0 %v3252_v1, %s3679_s30 }
 0x23b   : > { %v2208_v15 = vpop.permute.xlu1 %2207  ;;  %v1826_v25 = vpop.permute.xlu0 %1825 }
 0x23c   : > { %v2514_v35 = vsel %vm1142_vm3, %v2482_v19, %v2208_v15  ;;  %v2419_v17 = vsel %vm1043_vm0, %v4895_v3, %v1826_v25 }
 0x23d   : > { %2103 = vrot.lane.b32.xlu1 %v5113_v58, %s3677_s22  ;;  %2101 = vrot.lane.b32.xlu0 %v5116_v13, %s3677_s22 }
 0x23f   : > { %v1828_v46 = vpop.permute.xlu1 %1827  ;;  %v2334_v36 = vpop.permute.xlu0 %2333 }
 0x240   : > { %v2545_v22 = vsel %vm1175_vm4, %v2513_v50, %v2334_v36  ;;  %v2420_v3 = vsel %vm1043_vm0, %v4903_v23, %v1828_v46 }
 0x241   : > { %995 = vrot.lane.b32.xlu1 %v3345_v44, %s3679_s30  ;;  %2229 = vrot.lane.b32.xlu0 %v3315_v34, %s3678_s23 }
 0x242   : > { %3574 = vmatprep.mubr.msk.f32.mxu1 %vm1218_vm5, %v2545_v22 }
 0x243   : > { %v2336_v12 = vpop.permute.xlu1 %2335  ;;  %v1954_v32 = vpop.permute.xlu0 %1953 }
 0x244   : > { %v2546_v38 = vsel %vm1175_vm4, %v2514_v35, %v2336_v12  ;;  %v2451_v8 = vsel %vm1076_vm1, %v2419_v17, %v1954_v32 }
 0x245   : > { %2231 = vrot.lane.b32.xlu1 %v3316_v9, %s3678_s23  ;;  %1849 = vrot.lane.b32.xlu0 %v3315_v34, %s3675_s20 }
 0x246   : > { %3575 = vmatmul.mubr.msk.f32.gmra.mrb[12].mxu1 %vm1218_vm5, %v2546_v38 }
 0x247   : > { %v2082_v61 = vpop.permute.xlu1 %2081  ;;  %v1956_v39 = vpop.permute.xlu0 %1955 }
 0x248   : > { %v2483_v59 = vsel %vm1109_vm2, %v2451_v8, %v2082_v61  ;;  %v2452_v42 = vsel %vm1076_vm1, %v2420_v3, %v1956_v39  ;;  %v3319_v3 = vld [vmem:[%s3724_s19 + $0x181] sm:$0xff] }
 0x249   : > { %997 = vrot.lane.b32.xlu1 %v3252_v1, %s3679_s30  ;;  %2357 = vrot.lane.b32.xlu0 %v3347_v45, %s3679_s30 }
 0x24b   : > { %v2210_v63 = vpop.permute.xlu1 %2209  ;;  %v2084_v62 = vpop.permute.xlu0 %2083 }
 0x24c   : > { %v2515_v43 = vsel %vm1142_vm3, %v2483_v59, %v2210_v63  ;;  %v2484_v48 = vsel %vm1109_vm2, %v2452_v42, %v2084_v62  ;;  %v5241_v62 = vld [vmem:[%s3724_s19 + $0x188] sm:$0xff] }
 0x24d   : > { %1977 = vrot.lane.b32.xlu1 %v3347_v45, %s3676_s21  ;;  %1851 = vrot.lane.b32.xlu0 %v3316_v9, %s3675_s20 }
 0x24f   : > { %v2212_v7 = vpop.permute.xlu1 %2211  ;;  %v1830_v53 = vpop.permute.xlu0 %1829 }
 0x250   : > { %v2516_v14 = vsel %vm1142_vm3, %v2484_v48, %v2212_v7  ;;  %v2421_v36 = vsel %vm1043_vm0, %v4931_v4, %v1830_v53 }
 0x251   : > { %1979 = vrot.lane.b32.xlu1 %v3254_v5, %s3676_s21  ;;  %2359 = vrot.lane.b32.xlu0 %v3254_v5, %s3679_s30 }
 0x253   : > { %v1832_v30 = vpop.permute.xlu1 %1831  ;;  %v2338_v31 = vpop.permute.xlu0 %2337 }
 0x254   : > { %v2547_v27 = vsel %vm1175_vm4, %v2515_v43, %v2338_v31  ;;  %v2422_v12 = vsel %vm1043_vm0, %v4939_v16, %v1832_v30 }
 0x255   : > { %2107 = vrot.lane.b32.xlu1 %v5155_v33, %s3677_s22  ;;  %2105 = vrot.lane.b32.xlu0 %v5158_v26, %s3677_s22 }
 0x256   : > { %3577 = vmatprep.mubr.msk.f32.mxu1 %vm1218_vm5, %v2547_v27 }
 0x257   : > { %v2340_v23 = vpop.permute.xlu1 %2339  ;;  %v1958_v47 = vpop.permute.xlu0 %1957 }
 0x258   : > { %v2548_v44 = vsel %vm1175_vm4, %v2516_v14, %v2340_v23  ;;  %v2453_v0 = vsel %vm1076_vm1, %v2421_v36, %v1958_v47  ;;  %v3320_v47 = vld [vmem:[%s3724_s19 + $0x189] sm:$0xff] }
 0x259   : > { %999 = vrot.lane.b32.xlu1 %v3347_v45, %s3679_s30  ;;  %2233 = vrot.lane.b32.xlu0 %v3317_v41, %s3678_s23 }
 0x25a   : > { %3578 = vmatmul.mubr.msk.f32.gmra.mrb[14].mxu1 %vm1218_vm5, %v2548_v44 }
 0x25b   : > { %v2086_v10 = vpop.permute.xlu1 %2085  ;;  %v1960_v54 = vpop.permute.xlu0 %1959 }
 0x25c   : > { %v2485_v19 = vsel %vm1109_vm2, %v2453_v0, %v2086_v10  ;;  %v2454_v61 = vsel %vm1076_vm1, %v2422_v12, %v1960_v54  ;;  %v3258_v12 = vld [vmem:[%s3724_s19 + $0x18a] sm:$0xff] }
 0x25d   : > { %2235 = vrot.lane.b32.xlu1 %v3318_v37, %s3678_s23  ;;  %1853 = vrot.lane.b32.xlu0 %v3317_v41, %s3675_s20 }
 0x25e   : > { %v3504_v60 = vpop.f32.mrb[0].mxu0 }
 0x25f   : > { %v1387_v1 = vadd.f32 %v3504_v60, %v5182_v51  ;;  %v1381_v24 = vpop.f32.mrb[1].mxu0  ;;  %v2214_v21 = vpop.permute.xlu1 %2213 }
 0x260   : > { %v1382_v15 = vadd.f32 %v5182_v51, %v1381_v24  ;;  %v2088_v25 = vpop.permute.xlu0 %2087  ;;  %v2517_v32 = vsel %vm1142_vm3, %v2485_v19, %v2214_v21 }
 0x261   : > { %1541 = vst.msk [vmem:[%s5189_s24 + $0x8] sm:$0xff] %vm1076_vm1, %v1387_v1  ;;  %1001 = vrot.lane.b32.xlu1 %v3254_v5, %s3679_s30  ;;  %2361 = vrot.lane.b32.xlu0 %v5192_v56, %s3679_s30  ;;  %v2486_v16 = vsel %vm1109_vm2, %v2454_v61, %v2088_v25  ;;  %v5244_v5 = vld [vmem:[%s3724_s19 + $0x180] sm:$0xff] }
 0x262   : > { %1540 = vst.msk [vmem:[%s5189_s24] sm:$0xff] %vm1076_vm1, %v1382_v15  ;;  %v3507_v18 = vpop.f32.mrb[2].mxu0  ;;  %v5279_v1 = vld [vmem:[%s3724_s19 + $0x182] sm:$0xff] }
 0x263   : > { %v1397_v57 = vadd.f32 %v3507_v18, %v5182_v51  ;;  %v1391_v2 = vpop.f32.mrb[3].mxu0  ;;  %v2216_v34 = vpop.permute.xlu1 %2215 }
 0x264   : > { %v1392_v50 = vadd.f32 %v5182_v51, %v1391_v2  ;;  %v5205_v46 = vpop.permute.xlu0 %1833  ;;  %v2518_v7 = vsel %vm1142_vm3, %v2486_v16, %v2216_v34 }
 0x265   : > { %1543 = vst.msk [vmem:[%s5189_s24 + $0x28] sm:$0xff] %vm1076_vm1, %v1397_v57  ;;  %1981 = vrot.lane.b32.xlu1 %v5192_v56, %s3676_s21  ;;  %1855 = vrot.lane.b32.xlu0 %v3318_v37, %s3675_s20  ;;  %v2423_v57 = vsel %vm1043_vm0, %v4967_v6, %v5205_v46 }
 0x266   : > { %1542 = vst.msk [vmem:[%s5189_s24 + $0x20] sm:$0xff] %vm1076_vm1, %v1392_v50  ;;  %v3510_v22 = vpop.f32.mrb[4].mxu0 }
 0x267   : > { %v1407_v4 = vadd.f32 %v3510_v22, %v5182_v51  ;;  %v1401_v9 = vpop.f32.mrb[5].mxu0  ;;  %v5222_v35 = vpop.permute.xlu1 %1835 }
 0x268   : > { %v1402_v38 = vadd.f32 %v5182_v51, %v1401_v9  ;;  %v2342_v45 = vpop.permute.xlu0 %2341  ;;  %v2424_v0 = vsel %vm1043_vm0, %v4975_v11, %v5222_v35 }
 0x269   : > { %1545 = vst.msk [vmem:[%s5189_s24 + $0x48] sm:$0xff] %vm1076_vm1, %v1407_v4  ;;  %v2549_v39 = vsel %vm1175_vm4, %v2517_v32, %v2342_v45  ;;  %1983 = vrot.lane.b32.xlu1 %v5218_v55, %s3676_s21  ;;  %2363 = vrot.lane.b32.xlu0 %v5218_v55, %s3679_s30 }
 0x26a   : > { %1544 = vst.msk [vmem:[%s5189_s24 + $0x40] sm:$0xff] %vm1076_vm1, %v1402_v38  ;;  %v3513_v63 = vpop.f32.mrb[6].mxu0  ;;  %3580 = vmatprep.mubr.msk.f32.mxu1 %vm1218_vm5, %v2549_v39 }
 0x26b   : > { %v1417_v53 = vadd.f32 %v3513_v63, %v5182_v51  ;;  %v1411_v17 = vpop.f32.mrb[7].mxu0  ;;  %v2344_v8 = vpop.permute.xlu1 %2343 }
 0x26c   : > { %v1412_v59 = vadd.f32 %v5182_v51, %v1411_v17  ;;  %v2550_v43 = vsel %vm1175_vm4, %v2518_v7, %v2344_v8  ;;  %v1962_v30 = vpop.permute.xlu0 %1961  ;;  %v3289_v17 = vld [vmem:[%s3724_s19 + $0x198] sm:$0xff] }
 0x26d   : > { %1547 = vst.msk [vmem:[%s5189_s24 + $0x68] sm:$0xff] %vm1076_vm1, %v1417_v53  ;;  %2111 = vrot.lane.b32.xlu1 %v5241_v62, %s3677_s22  ;;  %2109 = vrot.lane.b32.xlu0 %v5244_v5, %s3677_s22  ;;  %v2455_v2 = vsel %vm1076_vm1, %v2423_v57, %v1962_v30  ;;  %v3290_v53 = vld [vmem:[%s3724_s19 + $0x1a0] sm:$0xff] }
 0x26e   : > { %1546 = vst.msk [vmem:[%s5189_s24 + $0x60] sm:$0xff] %vm1076_vm1, %v1412_v59  ;;  %v3516_v31 = vpop.f32.mrb[8].mxu0  ;;  %3581 = vmatmul.mubr.msk.f32.gmra.mrb[16].mxu1 %vm1218_vm5, %v2550_v43 }
 0x26f   : > { %v1427_v27 = vadd.f32 %v3516_v31, %v5182_v51  ;;  %v1421_v42 = vpop.f32.mrb[9].mxu0  ;;  %v2090_v48 = vpop.permute.xlu1 %2089 }
 0x270   : > { %v1422_v41 = vadd.f32 %v5182_v51, %v1421_v42  ;;  %v1964_v14 = vpop.permute.xlu0 %1963  ;;  %v2487_v50 = vsel %vm1109_vm2, %v2455_v2, %v2090_v48 }
 0x271   : > { %1549 = vst.msk [vmem:[%s5189_s24 + $0x88] sm:$0xff] %vm1076_vm1, %v1427_v27  ;;  %1003 = vrot.lane.b32.xlu1 %v5192_v56, %s3679_s30  ;;  %2237 = vrot.lane.b32.xlu0 %v3319_v3, %s3678_s23  ;;  %v2456_v4 = vsel %vm1076_vm1, %v2424_v0, %v1964_v14  ;;  %v3321_v27 = vld [vmem:[%s3724_s19 + $0x199] sm:$0xff] }
 0x272   : > { %1548 = vst.msk [vmem:[%s5189_s24 + $0x80] sm:$0xff] %vm1076_vm1, %v1422_v41  ;;  %v3519_v23 = vpop.f32.mrb[10].mxu0 }
 0x273   : > { %v1437_v44 = vadd.f32 %v3519_v23, %v5182_v51  ;;  %v1431_v37 = vpop.f32.mrb[11].mxu0  ;;  %v2218_v10 = vpop.permute.xlu1 %2217 }
 0x274   : > { %v1432_v54 = vadd.f32 %v5182_v51, %v1431_v37  ;;  %v2092_v60 = vpop.permute.xlu0 %2091  ;;  %v2519_v22 = vsel %vm1142_vm3, %v2487_v50, %v2218_v10 }
 0x275   : > { %1551 = vst.msk [vmem:[%s5189_s24 + $0xa8] sm:$0xff] %vm1076_vm1, %v1437_v44  ;;  %2239 = vrot.lane.b32.xlu1 %v3320_v47, %s3678_s23  ;;  %1857 = vrot.lane.b32.xlu0 %v3319_v3, %s3675_s20  ;;  %v2488_v11 = vsel %vm1109_vm2, %v2456_v4, %v2092_v60  ;;  %v3322_v44 = vld [vmem:[%s3724_s19 + $0x1a1] sm:$0xff] }
 0x276   : > { %1550 = vst.msk [vmem:[%s5189_s24 + $0xa0] sm:$0xff] %vm1076_vm1, %v1432_v54  ;;  %v3522_v56 = vpop.f32.mrb[12].mxu0 }
 0x277   : > { %v1447_v24 = vadd.f32 %v3522_v56, %v5182_v51  ;;  %v1441_v21 = vpop.f32.mrb[13].mxu0  ;;  %v2220_v15 = vpop.permute.xlu1 %2219  ;;  %v3354_v56 = vld [vmem:[%s3724_s19 + $0x1a2] sm:$0xff] }
 0x278   : > { %v1442_v25 = vadd.f32 %v5182_v51, %v1441_v21  ;;  %v5283_v18 = vpop.permute.xlu0 %1837  ;;  %v2520_v32 = vsel %vm1142_vm3, %v2488_v11, %v2220_v15  ;;  %v5877_v11 = vld [vmem:[#allocation62_spill] sm:$0xff] }
 0x279   : > { %1553 = vst.msk [vmem:[%s5189_s24 + $0xc8] sm:$0xff] %vm1076_vm1, %v1447_v24  ;;  %1005 = vrot.lane.b32.xlu1 %v5218_v55, %s3679_s30  ;;  %2365 = vrot.lane.b32.xlu0 %v5279_v1, %s3679_s30  ;;  %v2425_v54 = vsel %vm1043_vm0, %v5003_v28, %v5283_v18 }
 0x27a   : > { %1552 = vst.msk [vmem:[%s5189_s24 + $0xc0] sm:$0xff] %vm1076_vm1, %v1442_v25  ;;  %v3525_v34 = vpop.f32.mrb[14].mxu0 }
 0x27b   : > { %v1457_v36 = vadd.f32 %v3525_v34, %v5182_v51  ;;  %v1451_v6 = vpop.f32.mrb[15].mxu0  ;;  %v1840_v46 = vpop.permute.xlu1 %1839 }
 0x27c   : > { %v1452_v55 = vadd.f32 %v5182_v51, %v1451_v6  ;;  %v2346_v19 = vpop.permute.xlu0 %2345  ;;  %v2426_v21 = vsel %vm1043_vm0, %v5011_v49, %v1840_v46 }
 0x27d   : > { %1555 = vst.msk [vmem:[%s5189_s24 + $0xe8] sm:$0xff] %vm1076_vm1, %v1457_v36  ;;  %v2551_v9 = vsel %vm1175_vm4, %v2519_v22, %v2346_v19  ;;  %1985 = vrot.lane.b32.xlu1 %v5279_v1, %s3676_s21  ;;  %1859 = vrot.lane.b32.xlu0 %v3320_v47, %s3675_s20  ;;  %v3353_v47 = vld [vmem:[%s3724_s19 + $0x19a] sm:$0xff]  ;;  %v5876_v19 = vld [vmem:[#allocation39_spill] sm:$0xff] }
 0x27e   : > { %1554 = vst.msk [vmem:[%s5189_s24 + $0xe0] sm:$0xff] %vm1076_vm1, %v1452_v55  ;;  %v3528_v35 = vpop.f32.mrb[16].mxu0  ;;  %3583 = vmatprep.mubr.msk.f32.mxu1 %vm1218_vm5, %v2551_v9  ;;  %v3642_v55 = vld [vmem:[%s3724_s19 + $0x110] sm:$0xff] }
 0x27f   : > { %v1467_v38 = vadd.f32 %v3528_v35, %v5182_v51  ;;  %v1461_v45 = vpop.f32.mrb[17].mxu0  ;;  %v2348_v61 = vpop.permute.xlu1 %2347  ;;  %v1067_v4 = vsel %vm1043_vm0, %v3642_v55, %v5876_v19 }
 0x280   : > { %v1462_v39 = vadd.f32 %v5182_v51, %v1461_v45  ;;  %v2552_v16 = vsel %vm1175_vm4, %v2520_v32, %v2348_v61  ;;  %v1966_v63 = vpop.permute.xlu0 %1965  ;;  %v1100_v35 = vsel %vm1076_vm1, %v1067_v4, %v5877_v11  ;;  %v5886_v4 = vld [vmem:[#allocation80_spill] sm:$0xff] }
 0x281   : > { %1557 = vst.msk [vmem:[%s5189_s24 + $0x108] sm:$0xff] %vm1076_vm1, %v1467_v38  ;;  %1987 = vrot.lane.b32.xlu1 %v3258_v12, %s3676_s21  ;;  %2367 = vrot.lane.b32.xlu0 %v3258_v12, %s3679_s30  ;;  %v2457_v60 = vsel %vm1076_vm1, %v2425_v54, %v1966_v63  ;;  %v5878_v38 = vld [vmem:[#allocation78_spill] sm:$0xff] }
 0x282   : > { %1556 = vst.msk [vmem:[%s5189_s24 + $0x100] sm:$0xff] %vm1076_vm1, %v1462_v39  ;;  %v3531_v7 = vpop.f32.mrb[18].mxu0  ;;  %3584 = vmatmul.mubr.msk.f32.gmra.mrb[18].mxu1 %vm1218_vm5, %v2552_v16  ;;  %v1133_v45 = vsel %vm1109_vm2, %v1100_v35, %v5878_v38  ;;  %v5879_v63 = vld [vmem:[#allocation22_spill] sm:$0xff] }
 0x283   : > { %v1477_v8 = vadd.f32 %v3531_v7, %v5182_v51  ;;  %v1471_v59 = vpop.f32.mrb[19].mxu0  ;;  %v2094_v43 = vpop.permute.xlu1 %2093  ;;  %v1166_v7 = vsel %vm1142_vm3, %v1133_v45, %v5879_v63 }
 0x284   : > { %v1472_v30 = vadd.f32 %v5182_v51, %v1471_v59  ;;  %v1968_v31 = vpop.permute.xlu0 %1967 }
 0x285   : > { %1559 = vst.msk [vmem:[%s5189_s24 + $0x128] sm:$0xff] %vm1076_vm1, %v1477_v8  ;;  %2115 = vrot.lane.b32.xlu1 %v3290_v53, %s3677_s22  ;;  %2113 = vrot.lane.b32.xlu0 %v3289_v17, %s3677_s22  ;;  %v2458_v57 = vsel %vm1076_vm1, %v2426_v21, %v1968_v31  ;;  %v5883_v21 = vld [vmem:[#allocation94_spill] sm:$0xff] }
 0x286   : > { %1558 = vst.msk [vmem:[%s5189_s24 + $0x120] sm:$0xff] %vm1076_vm1, %v1472_v30  ;;  %v3534_v3 = vpop.f32.mrb[20].mxu0 }
 0x287   : > { %v1487_v42 = vadd.f32 %v3534_v3, %v5182_v51  ;;  %v1481_v48 = vpop.f32.mrb[21].mxu0  ;;  %v2222_v41 = vpop.permute.xlu1 %2221 }
 0x288   : > { %v1482_v14 = vadd.f32 %v5182_v51, %v1481_v48  ;;  %v2096_v23 = vpop.permute.xlu0 %2095 }
 0x289   : > { %1561 = vst.msk [vmem:[%s5189_s24 + $0x148] sm:$0xff] %vm1076_vm1, %v1487_v42  ;;  %1007 = vrot.lane.b32.xlu1 %v5279_v1, %s3679_s30  ;;  %2241 = vrot.lane.b32.xlu0 %v3321_v27, %s3678_s23  ;;  %v2489_v1 = vsel %vm1109_vm2, %v2457_v60, %v2094_v43  ;;  %v2490_v18 = vsel %vm1109_vm2, %v2458_v57, %v2096_v23  ;;  %v5881_v60 = vld [vmem:[#allocation65_spill] sm:$0xff] }
 0x28a   : > { %1560 = vst.msk [vmem:[%s5189_s24 + $0x140] sm:$0xff] %vm1076_vm1, %v1482_v14  ;;  %v2521_v15 = vsel %vm1142_vm3, %v2489_v1, %v2222_v41  ;;  %v5882_v1 = vld [vmem:[#allocation81_spill] sm:$0xff] }
 0x28b   : > { %v2224_v37 = vpop.permute.xlu1 %2223 }
 0x28c   : > { %v1842_v10 = vpop.permute.xlu0 %1841  ;;  %v2522_v2 = vsel %vm1142_vm3, %v2490_v18, %v2224_v37  ;;  %v3643_v37 = vld [vmem:[%s3724_s19 + $0x120] sm:$0xff] }
 0x28d   : > { %2369 = vrot.lane.b32.xlu1 %v3353_v47, %s3679_s30  ;;  %2243 = vrot.lane.b32.xlu0 %v3322_v44, %s3678_s23 }
 0x28f   : > { %v1844_v24 = vpop.permute.xlu1 %1843 }
 0x290   : > { %v2350_v25 = vpop.permute.xlu0 %2349  ;;  %v2428_v27 = vsel %vm1043_vm0, %v5047_v52, %v1844_v24 }
 0x291   : > { %v2553_v28 = vsel %vm1175_vm4, %v2521_v15, %v2350_v25  ;;  %2371 = vrot.lane.b32.xlu1 %v3354_v56, %s3679_s30  ;;  %1009 = vrot.lane.b32.xlu0 %v3258_v12, %s3679_s30  ;;  %v2427_v12 = vsel %vm1043_vm0, %v5039_v20, %v1842_v10  ;;  %v5880_v10 = vld [vmem:[#allocation44_spill] sm:$0xff] }
 0x292   : > { %3586 = vmatprep.mubr.msk.f32.mxu1 %vm1218_vm5, %v2553_v28  ;;  %v1068_v54 = vsel %vm1043_vm0, %v3643_v37, %v5880_v10  ;;  %v5891_v37 = vld [vmem:[#allocation96_spill] sm:$0xff] }
 0x293   : > { %v2352_v34 = vpop.permute.xlu1 %2351  ;;  %v1101_v56 = vsel %vm1076_vm1, %v1068_v54, %v5881_v60 }
 0x294   : > { %v2554_v49 = vsel %vm1175_vm4, %v2522_v2, %v2352_v34  ;;  %v1970_v50 = vpop.permute.xlu0 %1969  ;;  %v1134_v24 = vsel %vm1109_vm2, %v1101_v56, %v5882_v1 }
 0x295   : > { %3587 = vmatmul.mubr.msk.f32.gmra.mrb[20].mxu1 %vm1218_vm5, %v2554_v49  ;;  %v2459_v61 = vsel %vm1076_vm1, %v2427_v12, %v1970_v50  ;;  %v1167_v15 = vsel %vm1142_vm3, %v1134_v24, %v5883_v21  ;;  %v5887_v12 = vld [vmem:[#allocation21_spill] sm:$0xff]  ;;  %v3646_v24 = vld [vmem:[%s3724_s19 + $0x140] sm:$0xff]  ;;  %v5892_v21 = vld [vmem:[#allocation47_spill] sm:$0xff] }
 0x297   : > { %v2098_v36 = vpop.permute.xlu1 %2097 }
 0x298   : > { %v1972_v6 = vpop.permute.xlu0 %1971  ;;  %v2491_v53 = vsel %vm1109_vm2, %v2459_v61, %v2098_v36  ;;  %v3644_v36 = vld [vmem:[%s3724_s19 + $0x128] sm:$0xff] }
 0x299   : > { %v2460_v42 = vsel %vm1076_vm1, %v2428_v27, %v1972_v6  ;;  %v5884_v6 = vld [vmem:[#allocation43_spill] sm:$0xff]  ;;  %v5888_v27 = vld [vmem:[#allocation48_spill] sm:$0xff] }
 0x29b   : > { %v2226_v46 = vpop.permute.xlu1 %2225 }
 0x29c   : > { %v2100_v0 = vpop.permute.xlu0 %2099  ;;  %v2523_v59 = vsel %vm1142_vm3, %v2491_v53, %v2226_v46  ;;  %v1069_v46 = vsel %vm1043_vm0, %v3644_v36, %v5884_v6 }
 0x29d   : > { %v2492_v48 = vsel %vm1109_vm2, %v2460_v42, %v2100_v0 }
 0x29f   : > { %v2228_v22 = vpop.permute.xlu1 %2227 }
 0x2a0   : > { %v1846_v9 = vpop.permute.xlu0 %1845  ;;  %v2524_v14 = vsel %vm1142_vm3, %v2492_v48, %v2228_v22  ;;  %v5885_v22 = vld [vmem:[#allocation64_spill] sm:$0xff] }
 0x2a1   : > { %v3558_v32 = vpop.f32.mrb[0].mxu1  ;;  %v1102_v55 = vsel %vm1076_vm1, %v1069_v46, %v5885_v22  ;;  %v2429_v19 = vsel %vm1043_vm0, %v5075_v29, %v1846_v9 }
 0x2a2   : > { %v2744_v39 = vadd.f32 %v3558_v32, %v5182_v51  ;;  %v2738_v16 = vpop.f32.mrb[1].mxu1  ;;  %v1135_v11 = vsel %vm1109_vm2, %v1102_v55, %v5886_v4 }
 0x2a3   : > { %v2739_v17 = vadd.f32 %v5182_v51, %v2738_v16  ;;  %v994_v8 = vpop.permute.xlu1 %993  ;;  %v1168_v32 = vsel %vm1142_vm3, %v1135_v11, %v5887_v12 }
 0x2a4   : > { %3392 = vst.msk [vmem:[%s5189_s24 + $0x18] sm:$0xff] %vm1076_vm1, %v2744_v39  ;;  %v1199_v20 = vsel %vm1175_vm4, %v1166_v7, %v994_v8  ;;  %v2354_v43 = vpop.permute.xlu0 %2353 }
 0x2a5   : > { %3391 = vst.msk [vmem:[%s5189_s24 + $0x10] sm:$0xff] %vm1076_vm1, %v2739_v17  ;;  %v2555_v30 = vsel %vm1175_vm4, %v2523_v59, %v2354_v43  ;;  %3536 = vmatmul.mubr.msk.f32.gmra.mrb[22].mxu0 %vm1218_vm5, %v1199_v20 }
 0x2a6   : > { %3589 = vmatprep.mubr.msk.f32.mxu1 %vm1218_vm5, %v2555_v30 }
 0x2a7   : > { %v1974_v31 = vpop.permute.xlu1 %1973 }
 0x2a8   : > { %v1848_v3 = vpop.permute.xlu0 %1847  ;;  %v2461_v35 = vsel %vm1076_vm1, %v2429_v19, %v1974_v31  ;;  %v3645_v31 = vld [vmem:[%s3724_s19 + $0x138] sm:$0xff] }
 0x2a9   : > { %v2430_v7 = vsel %vm1043_vm0, %v5082_v40, %v1848_v3  ;;  %v1070_v42 = vsel %vm1043_vm0, %v3645_v31, %v5888_v27  ;;  %v5889_v3 = vld [vmem:[#allocation67_spill] sm:$0xff] }
 0x2aa   : > { %v1103_v48 = vsel %vm1076_vm1, %v1070_v42, %v5889_v3 }
 0x2ab   : > { %v1976_v41 = vpop.permute.xlu1 %1975 }
 0x2ac   : > { %v2356_v23 = vpop.permute.xlu0 %2355  ;;  %v2462_v53 = vsel %vm1076_vm1, %v2430_v7, %v1976_v41  ;;  %v5896_v7 = vld [vmem:[#allocation51_spill] sm:$0xff] }
 0x2ad   : > { %v2556_v47 = vsel %vm1175_vm4, %v2524_v14, %v2356_v23  ;;  %v5890_v14 = vld [vmem:[#allocation83_spill] sm:$0xff] }
 0x2ae   : > { %3590 = vmatmul.mubr.msk.f32.gmra.mrb[22].mxu1 %vm1218_vm5, %v2556_v47  ;;  %v1136_v23 = vsel %vm1109_vm2, %v1103_v48, %v5890_v14  ;;  %v3648_v48 = vld [vmem:[%s3724_s19 + $0x158] sm:$0xff] }
 0x2af   : > { %v2104_v44 = vpop.permute.xlu1 %2103  ;;  %v1169_v10 = vsel %vm1142_vm3, %v1136_v23, %v5891_v37 }
 0x2b0   : > { %v2102_v52 = vpop.permute.xlu0 %2101  ;;  %v2494_v17 = vsel %vm1109_vm2, %v2462_v53, %v2104_v44 }
 0x2b1   : > { %v2493_v38 = vsel %vm1109_vm2, %v2461_v35, %v2102_v52 }
 0x2b3   : > { %v996_v25 = vpop.permute.xlu1 %995 }
 0x2b4   : > { %v1200_v57 = vsel %vm1175_vm4, %v1167_v15, %v996_v25  ;;  %v2230_v28 = vpop.permute.xlu0 %2229  ;;  %v1071_v15 = vsel %vm1043_vm0, %v3646_v24, %v5892_v21 }
 0x2b5   : > { %v3561_v18 = vpop.f32.mrb[2].mxu1  ;;  %3538 = vmatprep.mubr.msk.f32.mxu0 %vm1218_vm5, %v1200_v57  ;;  %v2525_v61 = vsel %vm1142_vm3, %v2493_v38, %v2230_v28  ;;  %v5893_v57 = vld [vmem:[#allocation66_spill] sm:$0xff] }
 0x2b6   : > { %v2754_v2 = vadd.f32 %v3561_v18, %v5182_v51  ;;  %v2748_v34 = vpop.f32.mrb[3].mxu1  ;;  %v1104_v28 = vsel %vm1076_vm1, %v1071_v15, %v5893_v57 }
 0x2b7   : > { %v2749_v49 = vadd.f32 %v5182_v51, %v2748_v34  ;;  %v2232_v50 = vpop.permute.xlu1 %2231 }
 0x2b8   : > { %3394 = vst.msk [vmem:[%s5189_s24 + $0x38] sm:$0xff] %vm1076_vm1, %v2754_v2  ;;  %v1850_v0 = vpop.permute.xlu0 %1849  ;;  %v2526_v59 = vsel %vm1142_vm3, %v2494_v17, %v2232_v50  ;;  %v5894_v2 = vld [vmem:[#allocation82_spill] sm:$0xff]  ;;  %v5895_v50 = vld [vmem:[#allocation95_spill] sm:$0xff] }
 0x2b9   : > { %3393 = vst.msk [vmem:[%s5189_s24 + $0x30] sm:$0xff] %vm1076_vm1, %v2749_v49  ;;  %v2431_v18 = vsel %vm1043_vm0, %v5116_v13, %v1850_v0  ;;  %v1137_v34 = vsel %vm1109_vm2, %v1104_v28, %v5894_v2 }
 0x2ba   : > { %v1170_v36 = vsel %vm1142_vm3, %v1137_v34, %v5895_v50 }
 0x2bb   : > { %v998_v45 = vpop.permute.xlu1 %997 }
 0x2bc   : > { %v1201_v39 = vsel %vm1175_vm4, %v1168_v32, %v998_v45  ;;  %v2358_v16 = vpop.permute.xlu0 %2357 }
 0x2bd   : > { %v2557_v29 = vsel %vm1175_vm4, %v2525_v61, %v2358_v16  ;;  %3539 = vmatmul.mubr.msk.f32.gmra.mrb[24].mxu0 %vm1218_vm5, %v1201_v39 }
 0x2be   : > { %3592 = vmatprep.mubr.msk.f32.mxu1 %vm1218_vm5, %v2557_v29 }
 0x2bf   : > { %v1978_v9 = vpop.permute.xlu1 %1977 }
 0x2c0   : > { %v1852_v63 = vpop.permute.xlu0 %1851  ;;  %v2463_v49 = vsel %vm1076_vm1, %v2431_v18, %v1978_v9 }
 0x2c1   : > { %v2432_v11 = vsel %vm1043_vm0, %v5113_v58, %v1852_v63  ;;  %v3647_v63 = vld [vmem:[%s3724_s19 + $0x150] sm:$0xff] }
 0x2c2   : > { %v1072_v53 = vsel %vm1043_vm0, %v3647_v63, %v5896_v7 }
 0x2c3   : > { %v1980_v8 = vpop.permute.xlu1 %1979 }
 0x2c4   : > { %v2360_v20 = vpop.permute.xlu0 %2359  ;;  %v2464_v35 = vsel %vm1076_vm1, %v2432_v11, %v1980_v8  ;;  %v5897_v8 = vld [vmem:[#allocation69_spill] sm:$0xff] }
 0x2c5   : > { %v2558_v43 = vsel %vm1175_vm4, %v2526_v59, %v2360_v20  ;;  %v1105_v59 = vsel %vm1076_vm1, %v1072_v53, %v5897_v8  ;;  %v5898_v20 = vld [vmem:[#allocation85_spill] sm:$0xff] }
 0x2c6   : > { %3593 = vmatmul.mubr.msk.f32.gmra.mrb[24].mxu1 %vm1218_vm5, %v2558_v43  ;;  %v1138_v43 = vsel %vm1109_vm2, %v1105_v59, %v5898_v20  ;;  %v3650_v20 = vld [vmem:[%s3724_s19 + $0x170] sm:$0xff] }
 0x2c7   : > { %v2108_v30 = vpop.permute.xlu1 %2107 }
 0x2c8   : > { %v2106_v40 = vpop.permute.xlu0 %2105  ;;  %v2496_v12 = vsel %vm1109_vm2, %v2464_v35, %v2108_v30  ;;  %v5899_v30 = vld [vmem:[#allocation98_spill] sm:$0xff]  ;;  %v5905_v35 = vld [vmem:[#allocation71_spill] sm:$0xff] }
 0x2c9   : > { %v3564_v41 = vpop.f32.mrb[4].mxu1  ;;  %v2495_v6 = vsel %vm1109_vm2, %v2463_v49, %v2106_v40  ;;  %v1171_v31 = vsel %vm1142_vm3, %v1138_v43, %v5899_v30 }
 0x2ca   : > { %v2764_v47 = vadd.f32 %v3564_v41, %v5182_v51  ;;  %v2758_v44 = vpop.f32.mrb[5].mxu1  ;;  %v5900_v41 = vld [vmem:[#allocation50_spill] sm:$0xff] }
 0x2cb   : > { %v2759_v54 = vadd.f32 %v5182_v51, %v2758_v44  ;;  %v1000_v52 = vpop.permute.xlu1 %999  ;;  %v1073_v14 = vsel %vm1043_vm0, %v3648_v48, %v5900_v41  ;;  %v5911_v41 = vld [vmem:[#allocation99_spill] sm:$0xff] }
 0x2cc   : > { %3396 = vst.msk [vmem:[%s5189_s24 + $0x58] sm:$0xff] %vm1076_vm1, %v2764_v47  ;;  %v1202_v60 = vsel %vm1175_vm4, %v1169_v10, %v1000_v52  ;;  %v2234_v56 = vpop.permute.xlu0 %2233  ;;  %v5901_v47 = vld [vmem:[#allocation68_spill] sm:$0xff] }
 0x2cd   : > { %3395 = vst.msk [vmem:[%s5189_s24 + $0x50] sm:$0xff] %vm1076_vm1, %v2759_v54  ;;  %3541 = vmatprep.mubr.msk.f32.mxu0 %vm1218_vm5, %v1202_v60  ;;  %v2527_v22 = vsel %vm1142_vm3, %v2495_v6, %v2234_v56  ;;  %v1106_v44 = vsel %vm1076_vm1, %v1073_v14, %v5901_v47  ;;  %v5902_v10 = vld [vmem:[#allocation84_spill] sm:$0xff]  ;;  %v5903_v60 = vld [vmem:[#allocation97_spill] sm:$0xff] }
 0x2ce   : > { %v1139_v54 = vsel %vm1109_vm2, %v1106_v44, %v5902_v10 }
 0x2cf   : > { %v2236_v1 = vpop.permute.xlu1 %2235  ;;  %v1172_v56 = vsel %vm1142_vm3, %v1139_v54, %v5903_v60 }
 0x2d0   : > { %v1854_v25 = vpop.permute.xlu0 %1853  ;;  %v2528_v38 = vsel %vm1142_vm3, %v2496_v12, %v2236_v1 }
 0x2d1   : > { %v2433_v37 = vsel %vm1043_vm0, %v5158_v26, %v1854_v25 }
 0x2d3   : > { %v1002_v46 = vpop.permute.xlu1 %1001 }
 0x2d4   : > { %v1203_v55 = vsel %vm1175_vm4, %v1170_v36, %v1002_v46  ;;  %v2362_v19 = vpop.permute.xlu0 %2361 }
 0x2d5   : > { %v2559_v4 = vsel %vm1175_vm4, %v2527_v22, %v2362_v19  ;;  %3542 = vmatmul.mubr.msk.f32.gmra.mrb[26].mxu0 %vm1218_vm5, %v1203_v55 }
 0x2d6   : > { %3595 = vmatprep.mubr.msk.f32.mxu1 %vm1218_vm5, %v2559_v4  ;;  %v3649_v4 = vld [vmem:[%s3724_s19 + $0x168] sm:$0xff] }
 0x2d7   : > { %v1982_v13 = vpop.permute.xlu1 %1981 }
 0x2d8   : > { %v1856_v0 = vpop.permute.xlu0 %1855  ;;  %v2465_v52 = vsel %vm1076_vm1, %v2433_v37, %v1982_v13  ;;  %v5904_v13 = vld [vmem:[#allocation53_spill] sm:$0xff] }
 0x2d9   : > { %v2434_v18 = vsel %vm1043_vm0, %v5155_v33, %v1856_v0  ;;  %v1074_v0 = vsel %vm1043_vm0, %v3649_v4, %v5904_v13 }
 0x2da   : > { %v1107_v12 = vsel %vm1076_vm1, %v1074_v0, %v5905_v35 }
 0x2db   : > { %v1984_v32 = vpop.permute.xlu1 %1983 }
 0x2dc   : > { %v2364_v45 = vpop.permute.xlu0 %2363  ;;  %v2466_v34 = vsel %vm1076_vm1, %v2434_v18, %v1984_v32  ;;  %v5906_v32 = vld [vmem:[#allocation87_spill] sm:$0xff] }
 0x2dd   : > { %v2560_v61 = vsel %vm1175_vm4, %v2528_v38, %v2364_v45  ;;  %v3567_v39 = vpop.f32.mrb[6].mxu1  ;;  %v1140_v38 = vsel %vm1109_vm2, %v1107_v12, %v5906_v32  ;;  %v5907_v45 = vld [vmem:[#allocation100_spill] sm:$0xff] }
 0x2de   : > { %v2774_v16 = vadd.f32 %v3567_v39, %v5182_v51  ;;  %v2768_v29 = vpop.f32.mrb[7].mxu1  ;;  %3596 = vmatmul.mubr.msk.f32.gmra.mrb[26].mxu1 %vm1218_vm5, %v2560_v61  ;;  %v1173_v61 = vsel %vm1142_vm3, %v1140_v38, %v5907_v45 }
 0x2df   : > { %v2769_v58 = vadd.f32 %v5182_v51, %v2768_v29  ;;  %v2112_v9 = vpop.permute.xlu1 %2111 }
 0x2e0   : > { %3398 = vst.msk [vmem:[%s5189_s24 + $0x78] sm:$0xff] %vm1076_vm1, %v2774_v16  ;;  %v2110_v17 = vpop.permute.xlu0 %2109  ;;  %v2498_v36 = vsel %vm1109_vm2, %v2466_v34, %v2112_v9 }
 0x2e1   : > { %3397 = vst.msk [vmem:[%s5189_s24 + $0x70] sm:$0xff] %vm1076_vm1, %v2769_v58  ;;  %v2497_v1 = vsel %vm1109_vm2, %v2465_v52, %v2110_v17 }
 0x2e3   : > { %v1004_v27 = vpop.permute.xlu1 %1003 }
 0x2e4   : > { %v1204_v42 = vsel %vm1175_vm4, %v1171_v31, %v1004_v27  ;;  %v2238_v40 = vpop.permute.xlu0 %2237  ;;  %v5909_v31 = vld [vmem:[#allocation70_spill] sm:$0xff] }
 0x2e5   : > { %3544 = vmatprep.mubr.msk.f32.mxu0 %vm1218_vm5, %v1204_v42  ;;  %v2529_v21 = vsel %vm1142_vm3, %v2497_v1, %v2238_v40  ;;  %v5910_v40 = vld [vmem:[#allocation86_spill] sm:$0xff] }
 0x2e7   : > { %v2240_v3 = vpop.permute.xlu1 %2239 }
 0x2e8   : > { %v1858_v23 = vpop.permute.xlu0 %1857  ;;  %v2530_v22 = vsel %vm1142_vm3, %v2498_v36, %v2240_v3 }
 0x2e9   : > { %v2435_v16 = vsel %vm1043_vm0, %v5244_v5, %v1858_v23  ;;  %v5908_v5 = vld [vmem:[#allocation52_spill] sm:$0xff] }
 0x2ea   : > { %v1075_v43 = vsel %vm1043_vm0, %v3650_v20, %v5908_v5 }
 0x2eb   : > { %v1006_v24 = vpop.permute.xlu1 %1005  ;;  %v1108_v27 = vsel %vm1076_vm1, %v1075_v43, %v5909_v31 }
 0x2ec   : > { %v1205_v15 = vsel %vm1175_vm4, %v1172_v56, %v1006_v24  ;;  %v2366_v57 = vpop.permute.xlu0 %2365 }
 0x2ed   : > { %v2561_v28 = vsel %vm1175_vm4, %v2529_v21, %v2366_v57  ;;  %3545 = vmatmul.mubr.msk.f32.gmra.mrb[28].mxu0 %vm1218_vm5, %v1205_v15 }
 0x2ee   : > { %3598 = vmatprep.mubr.msk.f32.mxu1 %vm1218_vm5, %v2561_v28 }
 0x2ef   : > { %v1986_v26 = vpop.permute.xlu1 %1985 }
 0x2f0   : > { %v1860_v25 = vpop.permute.xlu0 %1859  ;;  %v2467_v9 = vsel %vm1076_vm1, %v2435_v16, %v1986_v26 }
 0x2f1   : > { %v3570_v2 = vpop.f32.mrb[8].mxu1  ;;  %v2436_v17 = vsel %vm1043_vm0, %v5241_v62, %v1860_v25  ;;  %v1141_v62 = vsel %vm1109_vm2, %v1108_v27, %v5910_v40 }
 0x2f2   : > { %v2784_v49 = vadd.f32 %v3570_v2, %v5182_v51  ;;  %v2778_v50 = vpop.f32.mrb[9].mxu1  ;;  %v1174_v14 = vsel %vm1142_vm3, %v1141_v62, %v5911_v41 }
 0x2f3   : > { %v2779_v6 = vadd.f32 %v5182_v51, %v2778_v50  ;;  %v1988_v46 = vpop.permute.xlu1 %1987 }
 0x2f4   : > { %3400 = vst.msk [vmem:[%s5189_s24 + $0x98] sm:$0xff] %vm1076_vm1, %v2784_v49  ;;  %v2368_v55 = vpop.permute.xlu0 %2367  ;;  %v2468_v30 = vsel %vm1076_vm1, %v2436_v17, %v1988_v46 }
 0x2f5   : > { %3399 = vst.msk [vmem:[%s5189_s24 + $0x90] sm:$0xff] %vm1076_vm1, %v2779_v6  ;;  %v2562_v33 = vsel %vm1175_vm4, %v2530_v22, %v2368_v55 }
 0x2f6   : > { %3599 = vmatmul.mubr.msk.f32.gmra.mrb[28].mxu1 %vm1218_vm5, %v2562_v33 }
 0x2f7   : > { %v2116_v19 = vpop.permute.xlu1 %2115 }
 0x2f8   : > { %v2114_v11 = vpop.permute.xlu0 %2113  ;;  %v2500_v42 = vsel %vm1109_vm2, %v2468_v30, %v2116_v19 }
 0x2f9   : > { %v2499_v63 = vsel %vm1109_vm2, %v2467_v9, %v2114_v11 }
 0x2fb   : > { %v1008_v39 = vpop.permute.xlu1 %1007 }
 0x2fc   : > { %v1206_v29 = vsel %vm1175_vm4, %v1173_v61, %v1008_v39  ;;  %v2242_v58 = vpop.permute.xlu0 %2241 }
 0x2fd   : > { %3547 = vmatprep.mubr.msk.f32.mxu0 %vm1218_vm5, %v1206_v29  ;;  %v2531_v7 = vsel %vm1142_vm3, %v2499_v63, %v2242_v58 }
 0x2ff   : > { %v2370_v53 = vpop.permute.xlu1 %2369 }
 0x300   : > { %v2563_v8 = vsel %vm1175_vm4, %v2531_v7, %v2370_v53  ;;  %v2244_v59 = vpop.permute.xlu0 %2243 }
 0x301   : > { %3601 = vmatprep.mubr.msk.f32.mxu1 %vm1218_vm5, %v2563_v8  ;;  %v2532_v3 = vsel %vm1142_vm3, %v2500_v42, %v2244_v59 }
 0x303   : > { %v2372_v48 = vpop.permute.xlu1 %2371 }
 0x304   : > { %v2564_v23 = vsel %vm1175_vm4, %v2532_v3, %v2372_v48  ;;  %v1010_v47 = vpop.permute.xlu0 %1009 }
 0x305   : > { %v1207_v44 = vsel %vm1175_vm4, %v1174_v14, %v1010_v47  ;;  %v3573_v37 = vpop.f32.mrb[10].mxu1  ;;  %3602 = vmatmul.mubr.msk.f32.gmra.mrb[30].mxu1 %vm1218_vm5, %v2564_v23 }
 0x306   : > { %v2794_v10 = vadd.f32 %v3573_v37, %v5182_v51  ;;  %3548 = vmatmul.mubr.msk.f32.gmra.mrb[30].mxu0 %vm1218_vm5, %v1207_v44  ;;  %v2788_v54 = vpop.f32.mrb[11].mxu1 }
 0x307   : > { %v2789_v52 = vadd.f32 %v5182_v51, %v2788_v54 }
 0x308   : > { %3402 = vst.msk [vmem:[%s5189_s24 + $0xb8] sm:$0xff] %vm1076_vm1, %v2794_v10 }
 0x309   : > { %3401 = vst.msk [vmem:[%s5189_s24 + $0xb0] sm:$0xff] %vm1076_vm1, %v2789_v52 }
 0x319   : > { %v3576_v60 = vpop.f32.mrb[12].mxu1 }
 0x31a   : > { %v2804_v56 = vadd.f32 %v3576_v60, %v5182_v51  ;;  %v2798_v1 = vpop.f32.mrb[13].mxu1 }
 0x31b   : > { %v2799_v24 = vadd.f32 %v5182_v51, %v2798_v1 }
 0x31c   : > { %3404 = vst.msk [vmem:[%s5189_s24 + $0xd8] sm:$0xff] %vm1076_vm1, %v2804_v56 }
 0x31d   : > { %3403 = vst.msk [vmem:[%s5189_s24 + $0xd0] sm:$0xff] %vm1076_vm1, %v2799_v24 }
 0x32d   : > { %v3579_v21 = vpop.f32.mrb[14].mxu1 }
 0x32e   : > { %v2814_v15 = vadd.f32 %v3579_v21, %v5182_v51  ;;  %v2808_v57 = vpop.f32.mrb[15].mxu1 }
 0x32f   : > { %v2809_v28 = vadd.f32 %v5182_v51, %v2808_v57 }
 0x330   : > { %3406 = vst.msk [vmem:[%s5189_s24 + $0xf8] sm:$0xff] %vm1076_vm1, %v2814_v15 }
 0x331   : > { %3405 = vst.msk [vmem:[%s5189_s24 + $0xf0] sm:$0xff] %vm1076_vm1, %v2809_v28 }
 0x341   : > { %v3582_v26 = vpop.f32.mrb[16].mxu1 }
 0x342   : > { %v2824_v25 = vadd.f32 %v3582_v26, %v5182_v51  ;;  %v2818_v18 = vpop.f32.mrb[17].mxu1 }
 0x343   : > { %v2819_v2 = vadd.f32 %v5182_v51, %v2818_v18 }
 0x344   : > { %3408 = vst.msk [vmem:[%s5189_s24 + $0x118] sm:$0xff] %vm1076_vm1, %v2824_v25 }
 0x345   : > { %3407 = vst.msk [vmem:[%s5189_s24 + $0x110] sm:$0xff] %vm1076_vm1, %v2819_v2 }
 0x355   : > { %v3585_v34 = vpop.f32.mrb[18].mxu1 }
 0x356   : > { %v2834_v49 = vadd.f32 %v3585_v34, %v5182_v51  ;;  %v2828_v50 = vpop.f32.mrb[19].mxu1 }
 0x357   : > { %v2829_v36 = vadd.f32 %v5182_v51, %v2828_v50 }
 0x358   : > { %3410 = vst.msk [vmem:[%s5189_s24 + $0x138] sm:$0xff] %vm1076_vm1, %v2834_v49 }
 0x359   : > { %3409 = vst.msk [vmem:[%s5189_s24 + $0x130] sm:$0xff] %vm1076_vm1, %v2829_v36 }
 0x368   : > { %v3588_v6 = vpop.f32.mrb[20].mxu1 }
 0x369   : > { %v2844_v46 = vadd.f32 %v3588_v6, %v5182_v51  ;;  %v2838_v22 = vpop.f32.mrb[21].mxu1 }
 0x36a   : > { %v2839_v55 = vadd.f32 %v5182_v51, %v2838_v22 }
 0x36b   : > { %3412 = vst.msk [vmem:[%s5189_s24 + $0x158] sm:$0xff] %vm1076_vm1, %v2844_v46 }
 0x36c   : > { %3411 = vst.msk [vmem:[%s5189_s24 + $0x150] sm:$0xff] %vm1076_vm1, %v2839_v55 }
 0x378   : > { %v3537_v33 = vpop.f32.mrb[22].mxu0 }
 0x379   : > { %v1497_v19 = vadd.f32 %v3537_v33, %v5182_v51  ;;  %v1491_v4 = vpop.f32.mrb[23].mxu0 }
 0x37a   : > { %v1492_v13 = vadd.f32 %v5182_v51, %v1491_v4 }
 0x37b   : > { %1563 = vst.msk [vmem:[%s5189_s24 + $0x168] sm:$0xff] %vm1076_vm1, %v1497_v19 }
 0x37c   : > { %1562 = vst.msk [vmem:[%s5189_s24 + $0x160] sm:$0xff] %vm1076_vm1, %v1492_v13 }
 0x381   : > { %v3591_v0 = vpop.f32.mrb[22].mxu1 }
 0x382   : > { %v2854_v11 = vadd.f32 %v3591_v0, %v5182_v51  ;;  %v2848_v35 = vpop.f32.mrb[23].mxu1 }
 0x383   : > { %v2849_v12 = vadd.f32 %v5182_v51, %v2848_v35 }
 0x384   : > { %3414 = vst.msk [vmem:[%s5189_s24 + $0x178] sm:$0xff] %vm1076_vm1, %v2854_v11 }
 0x385   : > { %3413 = vst.msk [vmem:[%s5189_s24 + $0x170] sm:$0xff] %vm1076_vm1, %v2849_v12 }
 0x390   : > { %v3540_v32 = vpop.f32.mrb[24].mxu0 }
 0x391   : > { %v1507_v38 = vadd.f32 %v3540_v32, %v5182_v51  ;;  %v1501_v45 = vpop.f32.mrb[25].mxu0 }
 0x392   : > { %v1502_v61 = vadd.f32 %v5182_v51, %v1501_v45 }
 0x393   : > { %1565 = vst.msk [vmem:[%s5189_s24 + $0x188] sm:$0xff] %vm1076_vm1, %v1507_v38 }
 0x394   : > { %1564 = vst.msk [vmem:[%s5189_s24 + $0x180] sm:$0xff] %vm1076_vm1, %v1502_v61 }
 0x399   : > { %v3594_v39 = vpop.f32.mrb[24].mxu1 }
 0x39a   : > { %v2864_v16 = vadd.f32 %v3594_v39, %v5182_v51  ;;  %v2858_v29 = vpop.f32.mrb[25].mxu1 }
 0x39b   : > { %v2859_v58 = vadd.f32 %v5182_v51, %v2858_v29 }
 0x39c   : > { %3416 = vst.msk [vmem:[%s5189_s24 + $0x198] sm:$0xff] %vm1076_vm1, %v2864_v16 }
 0x39d   : > { %3415 = vst.msk [vmem:[%s5189_s24 + $0x190] sm:$0xff] %vm1076_vm1, %v2859_v58 }
 0x3a8   : > { %v3543_v9 = vpop.f32.mrb[26].mxu0 }
 0x3a9   : > { %v1517_v63 = vadd.f32 %v3543_v9, %v5182_v51  ;;  %v1511_v7 = vpop.f32.mrb[27].mxu0 }
 0x3aa   : > { %v1512_v53 = vadd.f32 %v5182_v51, %v1511_v7 }
 0x3ab   : > { %1567 = vst.msk [vmem:[%s5189_s24 + $0x1a8] sm:$0xff] %vm1076_vm1, %v1517_v63 }
 0x3ac   : > { %1566 = vst.msk [vmem:[%s5189_s24 + $0x1a0] sm:$0xff] %vm1076_vm1, %v1512_v53 }
 0x3b1   : > { %v3597_v17 = vpop.f32.mrb[26].mxu1 }
 0x3b2   : > { %v2874_v8 = vadd.f32 %v3597_v17, %v5182_v51  ;;  %v2868_v59 = vpop.f32.mrb[27].mxu1 }
 0x3b3   : > { %v2869_v20 = vadd.f32 %v5182_v51, %v2868_v59 }
 0x3b4   : > { %3418 = vst.msk [vmem:[%s5189_s24 + $0x1b8] sm:$0xff] %vm1076_vm1, %v2874_v8 }
 0x3b5   : > { %3417 = vst.msk [vmem:[%s5189_s24 + $0x1b0] sm:$0xff] %vm1076_vm1, %v2869_v20 }
 0x3c0   : > { %v3546_v5 = vpop.f32.mrb[28].mxu0 }
 0x3c1   : > { %v1527_v43 = vadd.f32 %v3546_v5, %v5182_v51  ;;  %v1521_v30 = vpop.f32.mrb[29].mxu0 }
 0x3c2   : > { %v1522_v31 = vadd.f32 %v5182_v51, %v1521_v30 }
 0x3c3   : > { %1569 = vst.msk [vmem:[%s5189_s24 + $0x1c8] sm:$0xff] %vm1076_vm1, %v1527_v43 }
 0x3c4   : > { %1568 = vst.msk [vmem:[%s5189_s24 + $0x1c0] sm:$0xff] %vm1076_vm1, %v1522_v31 }
 0x3c9   : > { %v3600_v27 = vpop.f32.mrb[28].mxu1 }
 0x3ca   : > { %v2884_v42 = vadd.f32 %v3600_v27, %v5182_v51  ;;  %v2878_v40 = vpop.f32.mrb[29].mxu1 }
 0x3cb   : > { %v2879_v62 = vadd.f32 %v5182_v51, %v2878_v40 }
 0x3cc   : > { %3420 = vst.msk [vmem:[%s5189_s24 + $0x1d8] sm:$0xff] %vm1076_vm1, %v2884_v42 }
 0x3cd   : > { %3419 = vst.msk [vmem:[%s5189_s24 + $0x1d0] sm:$0xff] %vm1076_vm1, %v2879_v62 }
 0x3d8   : > { %v3603_v3 = vpop.f32.mrb[30].mxu1 }
 0x3d9   : > { %v3549_v48 = vpop.f32.mrb[30].mxu0  ;;  %v2894_v41 = vadd.f32 %v3603_v3, %v5182_v51  ;;  %v2888_v14 = vpop.f32.mrb[31].mxu1 }
 0x3da   : > { %v1537_v23 = vadd.f32 %v3549_v48, %v5182_v51  ;;  %v1531_v47 = vpop.f32.mrb[31].mxu0  ;;  %v2889_v44 = vadd.f32 %v5182_v51, %v2888_v14 }
 0x3db   : > { %3422 = vst.msk [vmem:[%s5189_s24 + $0x1f8] sm:$0xff] %vm1076_vm1, %v2894_v41  ;;  %v1532_v37 = vadd.f32 %v5182_v51, %v1531_v47 }
 0x3dc   : > { %1571 = vst.msk [vmem:[%s5189_s24 + $0x1e8] sm:$0xff] %vm1076_vm1, %v1537_v23  ;;  %3421 = vst.msk [vmem:[%s5189_s24 + $0x1f0] sm:$0xff] %vm1076_vm1, %v2889_v44 }
 0x3dd   : > { %1570 = vst.msk [vmem:[%s5189_s24 + $0x1e0] sm:$0xff] %vm1076_vm1, %v1532_v37 }
 0x3de PF: > { %s13_s14 = sadd.s32 1, %s3673_s14   ;;  %s5912_s12 = smov %s3669_s13 }
 0x3df   : > { %p10_p5 = scmp.ge.s32.totalorder %s13_s14, 4   ;;  %s5913_s13 = smov %s5915_s15 }
 0x3e1   :  { %12 = sbr.rel (!%p10_p5) target bundleno = 2 (0x2), region = 66 }

</bundles_post_ra>
